<compile_context>
chip_gen: v5e
topology: v5e:2x2
jax: 0.10.0
libtpu: 0.0.40
codegen_flags: <defaults>
</compile_context>

<pallas_src>
import functools

import jax
import jax.numpy as jnp
from jax import lax
from jax.experimental import pallas as pl
from jax.experimental.pallas import tpu as pltpu


def _round_up(x: int, m: int) -> int:
    return ((x + m - 1) // m) * m


def _device_generation() -> str:
    """Coarse TPU generation tag used only to pick tile sizes / caps."""
    try:
        kind = jax.devices()[0].device_kind.lower()
    except Exception:  # pragma: no cover
        return "unknown"
    for g in ("v5", "v6", "v7"):
        if g in kind:
            return g
    return "unknown"  # treated like v7x (most conservative VMEM)


def _decoder_kernel(z_ref, out_ref, *, tc: int, n_chunks: int,
                    mxu_bf16: bool, tanh_bf16: bool):
    # z_ref: (N_pad, D) resident latent matrix; out_ref: (TM, TN) output tile.
    i = pl.program_id(0)
    j = pl.program_id(1)
    tm, tn = out_ref.shape

    r0 = pl.multiple_of(i * tm, tm)
    zr = z_ref[pl.ds(r0, tm), :]                  # (tm, D) row block
    if mxu_bf16:
        zr = zr.astype(jnp.bfloat16)

    def chunk(c, carry):
        # Column sub-tile: dot -> sigmoid -> store, so only a (tm, tc) f32
        # intermediate ever lives in VMEM and stores overlap the MXU drain.
        src = pl.multiple_of(j * tn + c * tc, tc)
        zc = z_ref[pl.ds(src, tc), :]             # (tc, D) "column" block
        if mxu_bf16:
            zc = zc.astype(jnp.bfloat16)
        # NT matmul on the MXU: contract last dims, no transpose.
        s = lax.dot_general(
            zr, zc,
            dimension_numbers=(((1,), (1,)), ((), ())),
            preferred_element_type=jnp.float32,
        )
        x = 0.5 * s
        if tanh_bf16:
            x = x.astype(jnp.bfloat16)            # 2x EUP rate on v6e/v7x
        # sigmoid(x) == 0.5 * (tanh(x / 2) + 1): single EUP tanh per element.
        p = 0.5 * (jnp.tanh(x) + 1.0)
        dst = pl.multiple_of(c * tc, tc)
        out_ref[:, pl.ds(dst, tc)] = p.astype(out_ref.dtype)
        return carry

    lax.fori_loop(0, n_chunks, chunk, 0, unroll=True)


def inner_product_decoder(z, dropout: float = 0.0, training: bool = False, *,
                          tm: int | None = None, tn: int | None = None,
                          out_dtype=None, mxu_bf16: bool | None = None):
    """adj = sigmoid(z @ z.T), matching InnerProductDecoder.forward (eval mode).

    out_dtype=jnp.bfloat16 halves the HBM writeback (the kernel is write-bound)
    if downstream tolerates bf16; the default preserves the input dtype.
    """
    # TODO(synk): dropout is only active when training=True; eval-mode dropout
    # is the identity, so the dropout mask is not lowered into the kernel.
    assert not training, "kernel implements inference (training=False) semantics"

    N, D = z.shape
    out_dtype = z.dtype if out_dtype is None else jnp.dtype(out_dtype)
    gen = _device_generation()

    # Generation-specific defaults (review items: bigger tiles, bf16 MXU on v5e).
    if tm is None:
        tm = 512
    if tn is None:
        tn = 8192 if gen in ("v5", "v6") else 4096
    if mxu_bf16 is None:
        mxu_bf16 = (gen == "v5")                  # harmless elsewhere, needed on v5e
    vmem_cap = (96 << 20) if gen in ("v5", "v6") else (56 << 20)

    tc = 512                                       # in-kernel column chunk width
    tm_eff = min(tm, _round_up(N, 8))
    tn_eff = min(tn, _round_up(N, tc))             # always a multiple of tc
    tc_eff = min(tc, tn_eff)

    def vmem_needed(tm_e: int, tn_e: int) -> int:
        n_rows_ = _round_up(N, tm_e)
        n_cols_ = _round_up(N, tn_e)
        n_pad_ = max(n_rows_, n_cols_)
        out_bytes = tm_e * tn_e * jnp.dtype(out_dtype).itemsize
        z_bytes = n_pad_ * D * z.dtype.itemsize
        chunk_bytes = tm_e * tc_eff * 4            # f32 dot_general intermediate
        operand_bytes = 2 * (tm_e + tc_eff) * D * 4
        # 2x out tile (double-buffered), 2x z (worst case: fallback double
        # buffer), 2x chunk temp, operands, plus margin for internal scratch.
        return 2 * out_bytes + 2 * z_bytes + 2 * chunk_bytes + operand_bytes + (4 << 20)

    # Shrink tiles until the honest VMEM estimate fits this generation's cap.
    while vmem_needed(tm_eff, tn_eff) > vmem_cap:
        if tn_eff > tc_eff:
            tn_eff = max(tc_eff, _round_up(tn_eff // 2, tc_eff))
        elif tm_eff > 8:
            tm_eff = max(8, _round_up(tm_eff // 2, 8))
        else:
            break

    # Keep >= 2 grid steps along a "parallel" axis when possible so both v7x
    # TensorCores get work for small N.
    def grid_of(tm_e: int, tn_e: int):
        return (_round_up(N, tm_e) // tm_e, _round_up(N, tn_e) // tn_e)

    gm, gn = grid_of(tm_eff, tn_eff)
    while gm * gn < 2 and tm_eff > 8:
        tm_eff = max(8, _round_up(tm_eff // 2, 8))
        gm, gn = grid_of(tm_eff, tn_eff)

    n_rows = _round_up(N, tm_eff)
    n_cols = _round_up(N, tn_eff)
    n_pad = max(n_rows, n_cols)                    # z must cover row & col slices
    z_p = jnp.pad(z, ((0, n_pad - N), (0, 0))) if n_pad != N else z

    n_chunks = tn_eff // tc_eff
    tanh_bf16 = (out_dtype == jnp.bfloat16) and gen != "v5"  # v5e EUP has no bf16

    needed = vmem_needed(tm_eff, tn_eff)
    # Never clamp below the estimate; cap at the generation-specific budget.
    vmem_limit = int(min(max(needed, 32 << 20), max(vmem_cap, needed)))

    kernel = functools.partial(_decoder_kernel, tc=tc_eff, n_chunks=n_chunks,
                               mxu_bf16=mxu_bf16, tanh_bf16=tanh_bf16)

    def run(single_buffer_z: bool):
        if single_buffer_z:
            # z has a constant index_map -> one DMA; no point double-buffering.
            z_spec = pl.BlockSpec((n_pad, D), lambda i, j: (0, 0),
                                  pipeline_mode=pl.Buffered(1))
        else:
            z_spec = pl.BlockSpec((n_pad, D), lambda i, j: (0, 0))
        return pl.pallas_call(
            kernel,
            out_shape=jax.ShapeDtypeStruct((n_rows, n_cols), out_dtype),
            grid_spec=pltpu.PrefetchScalarGridSpec(
                num_scalar_prefetch=0,
                grid=(gm, gn),
                in_specs=[z_spec],
                out_specs=pl.BlockSpec((tm_eff, tn_eff), lambda i, j: (i, j)),
            ),
            compiler_params=pltpu.CompilerParams(
                dimension_semantics=("parallel", "parallel"),
                vmem_limit_bytes=vmem_limit,
            ),
        )(z_p)

    try:
        out_pad = run(True)
    except Exception:
        # pipeline_mode=pl.Buffered(1) not supported on this jax/libtpu combo:
        # fall back to the default (double-buffered) spec — costs VMEM only.
        out_pad = run(False)

    if n_rows != N or n_cols != N:
        out_pad = out_pad[:N, :N]
    return out_pad


if __name__ == "__main__":
    key = jax.random.PRNGKey(0)
    N, D = 256, 32  # small latent embedding: 256 nodes, 32-dim latent space
    z = jax.random.normal(key, (N, D), dtype=jnp.float32)

    gen = _device_generation()
    # On v5e the default path uses bf16 MXU operands -> looser tolerance there.
    f32_tol = dict(atol=2e-2, rtol=2e-2) if gen == "v5" else dict(atol=1e-5, rtol=1e-5)

    ref = jax.nn.sigmoid(z @ z.T)

    # Default (module-faithful f32) path.
    adj = jax.block_until_ready(inner_product_decoder(z, dropout=0.0, training=False))
    assert adj.shape == (N, N) and adj.dtype == z.dtype
    assert jnp.allclose(adj, ref, **f32_tol)

    # bf16 output path (halves HBM writeback on a write-bound kernel); looser tol.
    adj_bf16 = jax.block_until_ready(inner_product_decoder(z, out_dtype=jnp.bfloat16))
    assert adj_bf16.shape == (N, N) and adj_bf16.dtype == jnp.bfloat16
    assert jnp.allclose(adj_bf16.astype(jnp.float32), ref, atol=3e-2, rtol=3e-2)

    # Ragged / non-aligned N exercises the padding + tile-capping + grid>=2 path.
    N2 = 200
    z2 = jax.random.normal(jax.random.PRNGKey(1), (N2, D), dtype=jnp.float32)
    adj2 = jax.block_until_ready(inner_product_decoder(z2))
    ref2 = jax.nn.sigmoid(z2 @ z2.T)
    assert adj2.shape == (N2, N2)
    assert jnp.allclose(adj2, ref2, **f32_tol)

    print("KERNEL_OK")
</pallas_src>

<mosaic_0001>
module attributes {stable_mosaic.version = 11 : i64} {
  func.func @_decoder_kernel(%arg0: i32, %arg1: i32, %arg2: memref<512x32xf32, #tpu.memory_space<vmem>>, %arg3: memref<128x512xf32, #tpu.memory_space<vmem>>) attributes {dimension_semantics = [#tpu.dimension_semantics<parallel>, #tpu.dimension_semantics<parallel>], iteration_bounds = array<i64: 2, 1>, scalar_prefetch = 0 : i64, scratch_operands = 0 : i64, tpu.core_type = #tpu.core_type<tc>, window_params = [{pipeline_mode = #tpu.pipeline_mode<synchronous>, transform_indices = @transform_0, window_bounds = array<i64: 512, 32>}, {transform_indices = @transform_1, window_bounds = array<i64: 128, 512>}]} {
    %c128_i32 = arith.constant 128 : i32
    %0 = arith.muli %arg0, %c128_i32 : i32
    %1 = tpu.assume_multiple %0, 128 : i32
    %2 = arith.index_cast %1 : i32 to index
    %c0 = arith.constant 0 : index
    %3 = vector.load %arg2[%2, %c0] : memref<512x32xf32, #tpu.memory_space<vmem>>, vector<128x32xf32>
    %c0_i32 = arith.constant 0 : i32
    %c512_i32 = arith.constant 512 : i32
    %4 = arith.muli %arg1, %c512_i32 : i32
    %c512_i32_0 = arith.constant 512 : i32
    %5 = arith.muli %c0_i32, %c512_i32_0 : i32
    %6 = arith.addi %4, %5 : i32
    %7 = tpu.assume_multiple %6, 512 : i32
    %8 = arith.index_cast %7 : i32 to index
    %c0_1 = arith.constant 0 : index
    %9 = vector.load %arg2[%8, %c0_1] : memref<512x32xf32, #tpu.memory_space<vmem>>, vector<512x32xf32>
    %cst = arith.constant dense<0.000000e+00> : vector<128x512xf32>
    %10 = tpu.matmul %3, %9, %cst {dimension_numbers = #tpu.dot_dimension_numbers<[1], [1], [0], [0], [0, 0, 1, 0], [], []>} : vector<128x32xf32>, vector<512x32xf32>, vector<128x512xf32> -> vector<128x512xf32>
    %cst_2 = arith.constant 5.000000e-01 : f32
    %11 = vector.broadcast %cst_2 : f32 to vector<128x512xf32>
    %12 = arith.mulf %11, %10 : vector<128x512xf32>
    %13 = math.tanh %12 : vector<128x512xf32>
    %cst_3 = arith.constant 1.000000e+00 : f32
    %14 = vector.broadcast %cst_3 : f32 to vector<128x512xf32>
    %15 = arith.addf %13, %14 : vector<128x512xf32>
    %cst_4 = arith.constant 5.000000e-01 : f32
    %16 = vector.broadcast %cst_4 : f32 to vector<128x512xf32>
    %17 = arith.mulf %16, %15 : vector<128x512xf32>
    %c512_i32_5 = arith.constant 512 : i32
    %18 = arith.muli %c0_i32, %c512_i32_5 : i32
    %19 = tpu.assume_multiple %18, 512 : i32
    %c0_6 = arith.constant 0 : index
    %20 = arith.index_cast %19 : i32 to index
    %21 = vector.load %arg3[%c0_6, %20] : memref<128x512xf32, #tpu.memory_space<vmem>>, vector<128x512xf32>
    tpu.vector_store %arg3[%c0_6, %20], %17 {strides = array<i32>} : memref<128x512xf32, #tpu.memory_space<vmem>>, vector<128x512xf32>,
    %c1_i32 = arith.constant 1 : i32
    return
  }
  func.func @transform_0(%arg0: i32, %arg1: i32) -> (i32, i32) {
    %c0_i32 = arith.constant 0 : i32
    %c0_i32_0 = arith.constant 0 : i32
    %c0_i32_1 = arith.constant 0 : i32
    return %c0_i32, %c0_i32_0 : i32, i32
  }
  func.func @transform_1(%arg0: i32, %arg1: i32) -> (i32, i32) {
    %c0_i32 = arith.constant 0 : i32
    return %arg0, %arg1 : i32, i32
  }
}

module attributes {stable_mosaic.version = 11 : i64} {
  func.func @_decoder_kernel(%arg0: i32, %arg1: i32, %arg2: memref<512x32xf32, #tpu.memory_space<vmem>>, %arg3: memref<128x512xf32, #tpu.memory_space<vmem>>) attributes {dimension_semantics = [#tpu.dimension_semantics<parallel>, #tpu.dimension_semantics<parallel>], iteration_bounds = array<i64: 2, 1>, scalar_prefetch = 0 : i64, scratch_operands = 0 : i64, tpu.core_type = #tpu.core_type<tc>, window_params = [{pipeline_mode = #tpu.pipeline_mode<synchronous>, transform_indices = @transform_0, window_bounds = array<i64: 512, 32>}, {transform_indices = @transform_1, window_bounds = array<i64: 128, 512>}]} {
    %c128_i32 = arith.constant 128 : i32
    %0 = arith.muli %arg0, %c128_i32 : i32
    %1 = tpu.assume_multiple %0, 128 : i32
    %2 = arith.index_cast %1 : i32 to index
    %c0 = arith.constant 0 : index
    %3 = vector.load %arg2[%2, %c0] : memref<512x32xf32, #tpu.memory_space<vmem>>, vector<128x32xf32>
    %c0_i32 = arith.constant 0 : i32
    %c512_i32 = arith.constant 512 : i32
    %4 = arith.muli %arg1, %c512_i32 : i32
    %c512_i32_0 = arith.constant 512 : i32
    %5 = arith.muli %c0_i32, %c512_i32_0 : i32
    %6 = arith.addi %4, %5 : i32
    %7 = tpu.assume_multiple %6, 512 : i32
    %8 = arith.index_cast %7 : i32 to index
    %c0_1 = arith.constant 0 : index
    %9 = vector.load %arg2[%8, %c0_1] : memref<512x32xf32, #tpu.memory_space<vmem>>, vector<512x32xf32>
    %cst = arith.constant dense<0.000000e+00> : vector<128x512xf32>
    %10 = tpu.matmul %3, %9, %cst {dimension_numbers = #tpu.dot_dimension_numbers<[1], [1], [0], [0], [0, 0, 1, 0], [], []>} : vector<128x32xf32>, vector<512x32xf32>, vector<128x512xf32> -> vector<128x512xf32>
    %cst_2 = arith.constant 5.000000e-01 : f32
    %11 = vector.broadcast %cst_2 : f32 to vector<128x512xf32>
    %12 = arith.mulf %11, %10 : vector<128x512xf32>
    %13 = math.tanh %12 : vector<128x512xf32>
    %cst_3 = arith.constant 1.000000e+00 : f32
    %14 = vector.broadcast %cst_3 : f32 to vector<128x512xf32>
    %15 = arith.addf %13, %14 : vector<128x512xf32>
    %cst_4 = arith.constant 5.000000e-01 : f32
    %16 = vector.broadcast %cst_4 : f32 to vector<128x512xf32>
    %17 = arith.mulf %16, %15 : vector<128x512xf32>
    %c512_i32_5 = arith.constant 512 : i32
    %18 = arith.muli %c0_i32, %c512_i32_5 : i32
    %19 = tpu.assume_multiple %18, 512 : i32
    %c0_6 = arith.constant 0 : index
    %20 = arith.index_cast %19 : i32 to index
    %21 = vector.load %arg3[%c0_6, %20] : memref<128x512xf32, #tpu.memory_space<vmem>>, vector<128x512xf32>
    tpu.vector_store %arg3[%c0_6, %20], %17 {strides = array<i32>} : memref<128x512xf32, #tpu.memory_space<vmem>>, vector<128x512xf32>,
    %c1_i32 = arith.constant 1 : i32
    return
  }
  func.func @transform_0(%arg0: i32, %arg1: i32) -> (i32, i32) {
    %c0_i32 = arith.constant 0 : i32
    %c0_i32_0 = arith.constant 0 : i32
    %c0_i32_1 = arith.constant 0 : i32
    return %c0_i32, %c0_i32_0 : i32, i32
  }
  func.func @transform_1(%arg0: i32, %arg1: i32) -> (i32, i32) {
    %c0_i32 = arith.constant 0 : i32
    return %arg0, %arg1 : i32, i32
  }
}

</mosaic_0001>

<bundles_post_ra>
// kernel: tpu_custom_call.1
= control target key start
LH: loop header
LB: loop body
LE: loop exit
PB: predicated region body
PF: predicated region fallthrough
CT: control target
= control target key end

     0   :  { %6 = vsyncpa [#allocation3], 0  ;;  %s2024_s0 = inlined_call_operand.vmem [shape: f32[512,32], index: 0, kind: input, shape index: {}]   ;;  %s2025_s1 = inlined_call_operand.hbm [shape: f32[256,512], index: 1, kind: output, shape index: {}]  }
   0x1   :  { %8 = vsyncpa [#allocation3 + $0x1], 0  ;;  %s1519_s6 = smov 0   ;;  %s1521_s7 = smov 0  }
   0x2   :  { %s1523_s8 = smov 0   ;;  %s1525_s9 = smov 0  }
   0x3   :  { %s1527_s10 = smov 0   ;;  %s1529_s11 = smov 0  }
   0x4 LB: > { %s1100_s12 = sadd.s32 4294967295, %s1505_s11   ;;  %s1101_s13 = sadd.s32 4294967294, %s1505_s11   ;;  %s1505_s11 = sphi %s1529_s11, %s14_s11   ;;  %s1501_s10 = sphi %s1527_s10, %s2032_s10   ;;  %s1497_s9 = sphi %s1525_s9, %s2031_s9   ;;  %s1493_s8 = sphi %s1523_s8, %s2030_s8   ;;  %s1489_s7 = sphi %s1521_s7, %s2029_s7   ;;  %s1485_s6 = sphi %s1519_s6, %s2028_s6  }
   0x5   : > { %s26_s14 = sadd.s32 1, %s1501_s10  ;;  %s56_s15 = sadd.s32 1, %s1493_s8 }
   0x6   : > { %p28_p0 = scmp.ge.s32.totalorder %s26_s14, 2  ;;  %p66_p1 = scmp.ne.s32.totalorder %s1493_s8, %s1489_s7 }
   0x7   : > { %p67_p2 = scmp.eq.s32.totalorder %s1100_s12, 1  ;;  %p72_p3 = scmp.ne.s32.totalorder %s1489_s7, %s1485_s6 }
   0x8   : > { %s2034_s14 = smov (%p28_p0, %s26_s14), 0  ;;  %p73_p5 = scmp.eq.s32.totalorder %s1101_s13, 1 }
   0x9   : > { %p1559_p4 = por %p67_p2, %p66_p1  ;;  %s51_s17 = ssub.s32 %s1501_s10, %s2034_s14 }
   0xa   : > { %p1103_p6 = scmp.ge.s32.totalorder %s1505_s11, 1  ;;  %p54_p7 = scmp.eq.s32.totalorder %s51_s17, 0 }
   0xb   : > { %p1566_p8 = por %p73_p5, %p72_p3  ;;  %p94_p9 = scmp.lt.s32.totalorder %s1505_s11, 3 }
   0xc   : > { %s1572_s19 = scalar_select %p54_p7, %s1493_s8, %s56_s15  }
   0xd   : > { %p95_p10 = pnand %p1103_p6, %p94_p9 }
   0xe   : > { %s1105_s26 = sshll.u32 (!%p95_p10), %s1497_s9, 7  ;;  %s106_s17 = sand.u32 (!%p95_p10), 1, %s1489_s7  }
   0xf   : > { %98 = sbr.rel (%p95_p10) target bundleno = 354 (0x162), region = 24  ;;  %s1824_s4 = scalar_lea.vmem (!%p95_p10), %s2024_s0, %s1105_s26 }
  0x10   : > { %s1104_s20 = sshll.u32 (!%p95_p10), %s106_s17, 9  ;;  %s1241_s22 = sshll.u32 (!%p95_p10), %s1497_s9, 9 }
  0x11   : > { %s1919_s21 = scalar_lea.vmem (!%p95_p10), [#allocation2], %s1104_s20  ;;  %s1031_s25 = scalar_lea.hbm (!%p95_p10), %s2025_s1, %s1241_s22 }
  0x12   : > { %s1032_s9 = sshll.u32 (!%p95_p10), %s1919_s21, 4  ;;  %s1034_s26 = sshll.u32 (!%p95_p10), %s1031_s25, 4  ;;  %s1033_s9 = int_to_ptr.vmem [resolvable:$true] %s1032_s9  ;;  %s1035_s26 = int_to_ptr.hbm [resolvable:$true] %s1034_s26 }
  0x13   : > { %s1017_s27 = scalar_lea.sflag (!%p95_p10), [#allocation3], %s106_s17  ;;  %s1441_s28 = sshra.s32 (!%p95_p10), %s1035_s26, 4  ;;  %s1442_s28 = int_to_ptr.hbm [resolvable:$true] %s1441_s28 }
  0x14   : > { %v178_v0 = vld [vmem:[%s2024_s0 + $0x178] sm:$0xff]  ;;  %vm195_vm0 = vcmask 261120   ;;  %v177_v4 = vld [vmem:[%s2024_s0 + $0x170] sm:$0xff]  ;;  %v176_v8 = vld [vmem:[%s2024_s0 + $0x168] sm:$0xff]  ;;  %s1443_s29 = scalar_lea.hbm %s1442_s28, 512  ;;  %s1447_s3 = scalar_lea.hbm %s2025_s1, 1024 }
  0x15   : > { %v194_v1 = vld [vmem:[%s2024_s0 + $0x1f8] sm:$0xff]  ;;  %1170 = vmatpush.xpose.msk.msra.mxu2 %vm195_vm0, %v178_v0  ;;  %v193_v5 = vld [vmem:[%s2024_s0 + $0x1f0] sm:$0xff]  ;;  %v192_v9 = vld [vmem:[%s2024_s0 + $0x1e8] sm:$0xff]  ;;  %p1444_p11 = scmp.ne.s32.totalorder %s1442_s28, %s1443_s29  ;;  %p1448_p0 = scmp.lt.s32.totalorder %s1442_s28, %s2025_s1 }
  0x16   : > { %1202 = vmatpush.xpose.msk.msra.mxu3 %vm195_vm0, %v194_v1  ;;  %v146_v2 = vld [vmem:[%s2024_s0 + $0x78] sm:$0xff]  ;;  %v145_v6 = vld [vmem:[%s2024_s0 + $0x70] sm:$0xff]  ;;  %v144_v10 = vld [vmem:[%s2024_s0 + $0x68] sm:$0xff]  ;;  %p1449_p1 = scmp.lt.s32.totalorder %s1447_s3, %s1443_s29 }
  0x17   : > { %v162_v3 = vld [vmem:[%s2024_s0 + $0xf8] sm:$0xff]  ;;  %1106 = vmatpush.xpose.msk.msra.mxu0 %vm195_vm0, %v146_v2  ;;  %v161_v7 = vld [vmem:[%s2024_s0 + $0xf0] sm:$0xff]  ;;  %v160_v11 = vld [vmem:[%s2024_s0 + $0xe8] sm:$0xff]  ;;  %p1445_p12 = pnand %p1444_p11, %p1559_p4 }
  0x18   : > { %1138 = vmatpush.xpose.msk.msra.mxu1 %vm195_vm0, %v162_v3  ;;  %v175_v12 = vld [vmem:[%s2024_s0 + $0x160] sm:$0xff]  ;;  %v174_v16 = vld [vmem:[%s2024_s0 + $0x158] sm:$0xff]  ;;  %v173_v20 = vld [vmem:[%s2024_s0 + $0x150] sm:$0xff]  ;;  %p1450_p2 = por %p1449_p1, %p1448_p0 }
  0x19   : > { %1171 = vmatpush.xpose.msk.msra.mxu2 %vm195_vm0, %v177_v4  ;;  %v191_v13 = vld [vmem:[%s2024_s0 + $0x1e0] sm:$0xff]  ;;  %v190_v17 = vld [vmem:[%s2024_s0 + $0x1d8] sm:$0xff]  ;;  %v189_v21 = vld [vmem:[%s2024_s0 + $0x1d0] sm:$0xff]  ;;  %p1446_p13 = pneg %p1445_p12 }
  0x1a   : > { %1203 = vmatpush.xpose.msk.msra.mxu3 %vm195_vm0, %v193_v5  ;;  %v143_v14 = vld [vmem:[%s2024_s0 + $0x60] sm:$0xff]  ;;  %v142_v18 = vld [vmem:[%s2024_s0 + $0x58] sm:$0xff]  ;;  %v141_v22 = vld [vmem:[%s2024_s0 + $0x50] sm:$0xff] }
  0x1b   : > { %1107 = vmatpush.xpose.msk.msra.mxu0 %vm195_vm0, %v145_v6  ;;  %v159_v15 = vld [vmem:[%s2024_s0 + $0xe0] sm:$0xff]  ;;  %v158_v19 = vld [vmem:[%s2024_s0 + $0xd8] sm:$0xff]  ;;  %v157_v23 = vld [vmem:[%s2024_s0 + $0xd0] sm:$0xff]  ;;  %p1451_p3 = pnand %p1450_p2, %p1446_p13 }
  0x1c   : > { %1139 = vmatpush.xpose.msk.msra.mxu1 %vm195_vm0, %v161_v7  ;;  %v172_v24 = vld [vmem:[%s2024_s0 + $0x148] sm:$0xff]  ;;  %v171_v28 = vld [vmem:[%s2024_s0 + $0x140] sm:$0xff]  ;;  %v170_v32 = vld [vmem:[%s2024_s0 + $0x138] sm:$0xff] }
  0x1d   : > { %1172 = vmatpush.xpose.msk.msra.mxu2 %vm195_vm0, %v176_v8  ;;  %v188_v25 = vld [vmem:[%s2024_s0 + $0x1c8] sm:$0xff]  ;;  %v187_v29 = vld [vmem:[%s2024_s0 + $0x1c0] sm:$0xff]  ;;  %v186_v33 = vld [vmem:[%s2024_s0 + $0x1b8] sm:$0xff] }
  0x1e   : > { %1204 = vmatpush.xpose.msk.msra.mxu3 %vm195_vm0, %v192_v9  ;;  %v140_v26 = vld [vmem:[%s2024_s0 + $0x48] sm:$0xff]  ;;  %v139_v30 = vld [vmem:[%s2024_s0 + $0x40] sm:$0xff]  ;;  %v138_v34 = vld [vmem:[%s2024_s0 + $0x38] sm:$0xff] }
  0x1f   : > { %1108 = vmatpush.xpose.msk.msra.mxu0 %vm195_vm0, %v144_v10  ;;  %v156_v27 = vld [vmem:[%s2024_s0 + $0xc8] sm:$0xff]  ;;  %v155_v31 = vld [vmem:[%s2024_s0 + $0xc0] sm:$0xff]  ;;  %v154_v35 = vld [vmem:[%s2024_s0 + $0xb8] sm:$0xff] }
  0x20   : > { %1140 = vmatpush.xpose.msk.msra.mxu1 %vm195_vm0, %v160_v11  ;;  %v169_v36 = vld [vmem:[%s2024_s0 + $0x130] sm:$0xff]  ;;  %v168_v40 = vld [vmem:[%s2024_s0 + $0x128] sm:$0xff]  ;;  %v167_v44 = vld [vmem:[%s2024_s0 + $0x120] sm:$0xff] }
  0x21   : > { %1173 = vmatpush.xpose.msk.msra.mxu2 %vm195_vm0, %v175_v12  ;;  %v185_v37 = vld [vmem:[%s2024_s0 + $0x1b0] sm:$0xff]  ;;  %v184_v41 = vld [vmem:[%s2024_s0 + $0x1a8] sm:$0xff]  ;;  %v183_v45 = vld [vmem:[%s2024_s0 + $0x1a0] sm:$0xff] }
  0x22   : > { %1205 = vmatpush.xpose.msk.msra.mxu3 %vm195_vm0, %v191_v13  ;;  %v137_v38 = vld [vmem:[%s2024_s0 + $0x30] sm:$0xff]  ;;  %v136_v42 = vld [vmem:[%s2024_s0 + $0x28] sm:$0xff]  ;;  %v135_v46 = vld [vmem:[%s2024_s0 + $0x20] sm:$0xff] }
  0x23   : > { %1109 = vmatpush.xpose.msk.msra.mxu0 %vm195_vm0, %v143_v14  ;;  %v153_v39 = vld [vmem:[%s2024_s0 + $0xb0] sm:$0xff]  ;;  %v152_v43 = vld [vmem:[%s2024_s0 + $0xa8] sm:$0xff]  ;;  %v151_v47 = vld [vmem:[%s2024_s0 + $0xa0] sm:$0xff] }
  0x24   : > { %1141 = vmatpush.xpose.msk.msra.mxu1 %vm195_vm0, %v159_v15  ;;  %v166_v48 = vld [vmem:[%s2024_s0 + $0x118] sm:$0xff]  ;;  %v165_v52 = vld [vmem:[%s2024_s0 + $0x110] sm:$0xff]  ;;  %v164_v56 = vld [vmem:[%s2024_s0 + $0x108] sm:$0xff] }
  0x25   : > { %1174 = vmatpush.xpose.msk.msra.mxu2 %vm195_vm0, %v174_v16  ;;  %v182_v49 = vld [vmem:[%s2024_s0 + $0x198] sm:$0xff]  ;;  %v181_v53 = vld [vmem:[%s2024_s0 + $0x190] sm:$0xff]  ;;  %v180_v57 = vld [vmem:[%s2024_s0 + $0x188] sm:$0xff] }
  0x26   : > { %1206 = vmatpush.xpose.msk.msra.mxu3 %vm195_vm0, %v190_v17  ;;  %v134_v50 = vld [vmem:[%s2024_s0 + $0x18] sm:$0xff]  ;;  %v133_v54 = vld [vmem:[%s2024_s0 + $0x10] sm:$0xff]  ;;  %v132_v58 = vld [vmem:[%s2024_s0 + $0x8] sm:$0xff] }
  0x27   : > { %1110 = vmatpush.xpose.msk.msra.mxu0 %vm195_vm0, %v142_v18  ;;  %v150_v51 = vld [vmem:[%s2024_s0 + $0x98] sm:$0xff]  ;;  %v149_v55 = vld [vmem:[%s2024_s0 + $0x90] sm:$0xff]  ;;  %v148_v59 = vld [vmem:[%s2024_s0 + $0x88] sm:$0xff] }
  0x28   : > { %1142 = vmatpush.xpose.msk.msra.mxu1 %vm195_vm0, %v158_v19  ;;  %v163_v60 = vld [vmem:[%s2024_s0 + $0x100] sm:$0xff]  ;;  %v114_v1 = vld [vmem:[%s1824_s4 + $0x8] sm:$0xff]  ;;  %v115_v2 = vld [vmem:[%s1824_s4 + $0x10] sm:$0xff] }
  0x29   : > { %1175 = vmatpush.xpose.msk.msra.mxu2 %vm195_vm0, %v173_v20  ;;  %v179_v61 = vld [vmem:[%s2024_s0 + $0x180] sm:$0xff]  ;;  %v116_v3 = vld [vmem:[%s1824_s4 + $0x18] sm:$0xff]  ;;  %v118_v5 = vld [vmem:[%s1824_s4 + $0x28] sm:$0xff] }
  0x2a   : > { %1207 = vmatpush.xpose.msk.msra.mxu3 %vm195_vm0, %v189_v21  ;;  %v131_v62 = vld [vmem:[%s2024_s0] sm:$0xff]  ;;  %v119_v6 = vld [vmem:[%s1824_s4 + $0x30] sm:$0xff]  ;;  %v120_v7 = vld [vmem:[%s1824_s4 + $0x38] sm:$0xff] }
  0x2b   : > { %1111 = vmatpush.xpose.msk.msra.mxu0 %vm195_vm0, %v141_v22  ;;  %v147_v63 = vld [vmem:[%s2024_s0 + $0x80] sm:$0xff]  ;;  %v122_v9 = vld [vmem:[%s1824_s4 + $0x48] sm:$0xff]  ;;  %v123_v10 = vld [vmem:[%s1824_s4 + $0x50] sm:$0xff] }
  0x2c   : > { %1143 = vmatpush.xpose.msk.msra.mxu1 %vm195_vm0, %v157_v23  ;;  %v113_v0 = vld [vmem:[%s1824_s4] sm:$0xff]  ;;  %v124_v11 = vld [vmem:[%s1824_s4 + $0x58] sm:$0xff]  ;;  %v126_v13 = vld [vmem:[%s1824_s4 + $0x68] sm:$0xff] }
  0x2d   : > { %1176 = vmatpush.xpose.msk.msra.mxu2 %vm195_vm0, %v172_v24  ;;  %v117_v4 = vld [vmem:[%s1824_s4 + $0x20] sm:$0xff]  ;;  %v127_v14 = vld [vmem:[%s1824_s4 + $0x70] sm:$0xff]  ;;  %v128_v15 = vld [vmem:[%s1824_s4 + $0x78] sm:$0xff] }
  0x2e   : > { %1208 = vmatpush.xpose.msk.msra.mxu3 %vm195_vm0, %v188_v25  ;;  %v121_v8 = vld [vmem:[%s1824_s4 + $0x40] sm:$0xff] }
  0x2f   : > { %1112 = vmatpush.xpose.msk.msra.mxu0 %vm195_vm0, %v140_v26  ;;  %v125_v12 = vld [vmem:[%s1824_s4 + $0x60] sm:$0xff] }
  0x30   : > { %1144 = vmatpush.xpose.msk.msra.mxu1 %vm195_vm0, %v156_v27 }
  0x31   : > { %1177 = vmatpush.xpose.msk.msra.mxu2 %vm195_vm0, %v171_v28 }
  0x32   : > { %1209 = vmatpush.xpose.msk.msra.mxu3 %vm195_vm0, %v187_v29 }
  0x33   : > { %1113 = vmatpush.xpose.msk.msra.mxu0 %vm195_vm0, %v139_v30 }
  0x34   : > { %1145 = vmatpush.xpose.msk.msra.mxu1 %vm195_vm0, %v155_v31 }
  0x35   : > { %1178 = vmatpush.xpose.msk.msra.mxu2 %vm195_vm0, %v170_v32 }
  0x36   : > { %1210 = vmatpush.xpose.msk.msra.mxu3 %vm195_vm0, %v186_v33 }
  0x37   : > { %1114 = vmatpush.xpose.msk.msra.mxu0 %vm195_vm0, %v138_v34 }
  0x38   : > { %1146 = vmatpush.xpose.msk.msra.mxu1 %vm195_vm0, %v154_v35 }
  0x39   : > { %1179 = vmatpush.xpose.msk.msra.mxu2 %vm195_vm0, %v169_v36 }
  0x3a   : > { %1211 = vmatpush.xpose.msk.msra.mxu3 %vm195_vm0, %v185_v37 }
  0x3b   : > { %1115 = vmatpush.xpose.msk.msra.mxu0 %vm195_vm0, %v137_v38 }
  0x3c   : > { %1147 = vmatpush.xpose.msk.msra.mxu1 %vm195_vm0, %v153_v39 }
  0x3d   : > { %1180 = vmatpush.xpose.msk.msra.mxu2 %vm195_vm0, %v168_v40 }
  0x3e   : > { %1212 = vmatpush.xpose.msk.msra.mxu3 %vm195_vm0, %v184_v41 }
  0x3f   : > { %1116 = vmatpush.xpose.msk.msra.mxu0 %vm195_vm0, %v136_v42 }
  0x40   : > { %1148 = vmatpush.xpose.msk.msra.mxu1 %vm195_vm0, %v152_v43 }
  0x41   : > { %1181 = vmatpush.xpose.msk.msra.mxu2 %vm195_vm0, %v167_v44 }
  0x42   : > { %1213 = vmatpush.xpose.msk.msra.mxu3 %vm195_vm0, %v183_v45 }
  0x43   : > { %1117 = vmatpush.xpose.msk.msra.mxu0 %vm195_vm0, %v135_v46 }
  0x44   : > { %1149 = vmatpush.xpose.msk.msra.mxu1 %vm195_vm0, %v151_v47 }
  0x45   : > { %1182 = vmatpush.xpose.msk.msra.mxu2 %vm195_vm0, %v166_v48 }
  0x46   : > { %1214 = vmatpush.xpose.msk.msra.mxu3 %vm195_vm0, %v182_v49 }
  0x47   : > { %1118 = vmatpush.xpose.msk.msra.mxu0 %vm195_vm0, %v134_v50 }
  0x48   : > { %1150 = vmatpush.xpose.msk.msra.mxu1 %vm195_vm0, %v150_v51 }
  0x49   : > { %1183 = vmatpush.xpose.msk.msra.mxu2 %vm195_vm0, %v165_v52 }
  0x4a   : > { %1215 = vmatpush.xpose.msk.msra.mxu3 %vm195_vm0, %v181_v53 }
  0x4b   : > { %1119 = vmatpush.xpose.msk.msra.mxu0 %vm195_vm0, %v133_v54 }
  0x4c   : > { %1151 = vmatpush.xpose.msk.msra.mxu1 %vm195_vm0, %v149_v55 }
  0x4d   : > { %1184 = vmatpush.xpose.msk.msra.mxu2 %vm195_vm0, %v164_v56 }
  0x4e   : > { %1216 = vmatpush.xpose.msk.msra.mxu3 %vm195_vm0, %v180_v57 }
  0x4f   : > { %1120 = vmatpush.xpose.msk.msra.mxu0 %vm195_vm0, %v132_v58 }
  0x50   : > { %1152 = vmatpush.xpose.msk.msra.mxu1 %vm195_vm0, %v148_v59 }
  0x51   : > { %1185 = vmatpush.xpose.msk.msra.mxu2 %vm195_vm0, %v163_v60 }
  0x52   : > { %1217 = vmatpush.xpose.msk.msra.mxu3 %vm195_vm0, %v179_v61 }
  0x53   : > { %1121 = vmatpush.xpose.msk.msra.mxu0 %vm195_vm0, %v131_v62 }
  0x54   : > { %1153 = vmatpush.xpose.msk.msra.mxu1 %vm195_vm0, %v147_v63  ;;  %1186 = vmatmul.msk.f32.vlgmr.msra.gmra.mxu2 %vm195_vm0, %v113_v0 }
  0x55   : > { %1218 = vmatmul.msk.f32.vlgmr.msra.gmra.mxu3 %vm195_vm0, %v113_v0 }
  0x56   : > { %1122 = vmatmul.msk.f32.vlgmr.msra.gmra.mxu0 %vm195_vm0, %v113_v0 }
  0x57   : > { %1154 = vmatmul.msk.f32.vlgmr.msra.gmra.mxu1 %vm195_vm0, %v113_v0 }
  0x5c   : > { %1187 = vmatmul.msk.f32.gmra.mxu2 %vm195_vm0, %v114_v1 }
  0x5d   : > { %1219 = vmatmul.msk.f32.gmra.mxu3 %vm195_vm0, %v114_v1 }
  0x5e   : > { %1123 = vmatmul.msk.f32.gmra.mxu0 %vm195_vm0, %v114_v1 }
  0x5f   : > { %1155 = vmatmul.msk.f32.gmra.mxu1 %vm195_vm0, %v114_v1 }
  0x64   : > { %1188 = vmatmul.msk.f32.gmra.mxu2 %vm195_vm0, %v115_v2 }
  0x65   : > { %1220 = vmatmul.msk.f32.gmra.mxu3 %vm195_vm0, %v115_v2 }
  0x66   : > { %1124 = vmatmul.msk.f32.gmra.mxu0 %vm195_vm0, %v115_v2 }
  0x67   : > { %1156 = vmatmul.msk.f32.gmra.mxu1 %vm195_vm0, %v115_v2 }
  0x6c   : > { %1189 = vmatmul.msk.f32.gmra.mxu2 %vm195_vm0, %v116_v3 }
  0x6d   : > { %1221 = vmatmul.msk.f32.gmra.mxu3 %vm195_vm0, %v116_v3 }
  0x6e   : > { %1125 = vmatmul.msk.f32.gmra.mxu0 %vm195_vm0, %v116_v3 }
  0x6f   : > { %1157 = vmatmul.msk.f32.gmra.mxu1 %vm195_vm0, %v116_v3 }
  0x74   : > { %1190 = vmatmul.msk.f32.gmra.mxu2 %vm195_vm0, %v117_v4 }
  0x75   : > { %1222 = vmatmul.msk.f32.gmra.mxu3 %vm195_vm0, %v117_v4 }
  0x76   : > { %1126 = vmatmul.msk.f32.gmra.mxu0 %vm195_vm0, %v117_v4 }
  0x77   : > { %1158 = vmatmul.msk.f32.gmra.mxu1 %vm195_vm0, %v117_v4 }
  0x7c   : > { %1191 = vmatmul.msk.f32.gmra.mxu2 %vm195_vm0, %v118_v5 }
  0x7d   : > { %1223 = vmatmul.msk.f32.gmra.mxu3 %vm195_vm0, %v118_v5 }
  0x7e   : > { %1127 = vmatmul.msk.f32.gmra.mxu0 %vm195_vm0, %v118_v5 }
  0x7f   : > { %1159 = vmatmul.msk.f32.gmra.mxu1 %vm195_vm0, %v118_v5 }
  0x84   : > { %1192 = vmatmul.msk.f32.gmra.mxu2 %vm195_vm0, %v119_v6 }
  0x85   : > { %1224 = vmatmul.msk.f32.gmra.mxu3 %vm195_vm0, %v119_v6 }
  0x86   : > { %1128 = vmatmul.msk.f32.gmra.mxu0 %vm195_vm0, %v119_v6 }
  0x87   : > { %1160 = vmatmul.msk.f32.gmra.mxu1 %vm195_vm0, %v119_v6 }
  0x8c   : > { %1193 = vmatmul.msk.f32.gmra.mxu2 %vm195_vm0, %v120_v7 }
  0x8d   : > { %1225 = vmatmul.msk.f32.gmra.mxu3 %vm195_vm0, %v120_v7 }
  0x8e   : > { %1129 = vmatmul.msk.f32.gmra.mxu0 %vm195_vm0, %v120_v7 }
  0x8f   : > { %1161 = vmatmul.msk.f32.gmra.mxu1 %vm195_vm0, %v120_v7 }
  0x94   : > { %1194 = vmatmul.msk.f32.gmra.mxu2 %vm195_vm0, %v121_v8 }
  0x95   : > { %1226 = vmatmul.msk.f32.gmra.mxu3 %vm195_vm0, %v121_v8 }
  0x96   : > { %1130 = vmatmul.msk.f32.gmra.mxu0 %vm195_vm0, %v121_v8 }
  0x97   : > { %1162 = vmatmul.msk.f32.gmra.mxu1 %vm195_vm0, %v121_v8 }
  0x9c   : > { %1195 = vmatmul.msk.f32.gmra.mxu2 %vm195_vm0, %v122_v9 }
  0x9d   : > { %1227 = vmatmul.msk.f32.gmra.mxu3 %vm195_vm0, %v122_v9 }
  0x9e   : > { %1131 = vmatmul.msk.f32.gmra.mxu0 %vm195_vm0, %v122_v9 }
  0x9f   : > { %1163 = vmatmul.msk.f32.gmra.mxu1 %vm195_vm0, %v122_v9 }
  0xa4   : > { %1196 = vmatmul.msk.f32.gmra.mxu2 %vm195_vm0, %v123_v10 }
  0xa5   : > { %1228 = vmatmul.msk.f32.gmra.mxu3 %vm195_vm0, %v123_v10 }
  0xa6   : > { %1132 = vmatmul.msk.f32.gmra.mxu0 %vm195_vm0, %v123_v10 }
  0xa7   : > { %1164 = vmatmul.msk.f32.gmra.mxu1 %vm195_vm0, %v123_v10 }
  0xac   : > { %1197 = vmatmul.msk.f32.gmra.mxu2 %vm195_vm0, %v124_v11 }
  0xad   : > { %1229 = vmatmul.msk.f32.gmra.mxu3 %vm195_vm0, %v124_v11 }
  0xae   : > { %1133 = vmatmul.msk.f32.gmra.mxu0 %vm195_vm0, %v124_v11 }
  0xaf   : > { %1165 = vmatmul.msk.f32.gmra.mxu1 %vm195_vm0, %v124_v11 }
  0xb4   : > { %1198 = vmatmul.msk.f32.gmra.mxu2 %vm195_vm0, %v125_v12 }
  0xb5   : > { %1230 = vmatmul.msk.f32.gmra.mxu3 %vm195_vm0, %v125_v12 }
  0xb6   : > { %1134 = vmatmul.msk.f32.gmra.mxu0 %vm195_vm0, %v125_v12 }
  0xb7   : > { %1166 = vmatmul.msk.f32.gmra.mxu1 %vm195_vm0, %v125_v12 }
  0xbc   : > { %1199 = vmatmul.msk.f32.gmra.mxu2 %vm195_vm0, %v126_v13 }
  0xbd   : > { %1231 = vmatmul.msk.f32.gmra.mxu3 %vm195_vm0, %v126_v13 }
  0xbe   : > { %1135 = vmatmul.msk.f32.gmra.mxu0 %vm195_vm0, %v126_v13 }
  0xbf   : > { %1167 = vmatmul.msk.f32.gmra.mxu1 %vm195_vm0, %v126_v13 }
  0xc4   : > { %1200 = vmatmul.msk.f32.gmra.mxu2 %vm195_vm0, %v127_v14 }
  0xc5   : > { %1232 = vmatmul.msk.f32.gmra.mxu3 %vm195_vm0, %v127_v14 }
  0xc6   : > { %1136 = vmatmul.msk.f32.gmra.mxu0 %vm195_vm0, %v127_v14 }
  0xc7   : > { %1168 = vmatmul.msk.f32.gmra.mxu1 %vm195_vm0, %v127_v14 }
  0xcc   : > { %1201 = vmatmul.msk.f32.gmra.mxu2 %vm195_vm0, %v128_v15 }
  0xcd   : > { %1233 = vmatmul.msk.f32.gmra.mxu3 %vm195_vm0, %v128_v15 }
  0xce   : > { %1137 = vmatmul.msk.f32.gmra.mxu0 %vm195_vm0, %v128_v15 }
  0xcf   : > { %1169 = vmatmul.msk.f32.gmra.mxu1 %vm195_vm0, %v128_v15 }
  0xd3   : > { %v453_v16 = vpop.f32.mrf.mxu0 }
  0xd4   : > { %v518_v17 = vpop.f32.mrf.mxu1  ;;  %v696_v18 = vmul.f32 0.5, %v453_v16 }
  0xd5   : > { %v697_v19 = vmul.f32 0.5, %v518_v17 }
  0xd6   : > { %1299 = vtanh.f32 %v696_v18 }
  0xd7   : > { %1301 = vtanh.f32 %v697_v19  ;;  %v583_v20 = vpop.f32.mrf.mxu2 }
  0xd8   : > { %v648_v21 = vpop.f32.mrf.mxu3  ;;  %v698_v22 = vmul.f32 0.5, %v583_v20 }
  0xd9   : > { %v699_v23 = vmul.f32 0.5, %v648_v21 }
  0xda   : > { %1303 = vtanh.f32 %v698_v22 }
  0xdb   : > { %v456_v24 = vpop.f32.mrf.mxu0  ;;  %1305 = vtanh.f32 %v699_v23 }
  0xdc   : > { %v521_v25 = vpop.f32.mrf.mxu1  ;;  %v1300_v26 = vpop.eup %1299  ;;  %v700_v27 = vmul.f32 0.5, %v456_v24 }
  0xdd   : > { %v701_v28 = vmul.f32 0.5, %v521_v25  ;;  %v1302_v29 = vpop.eup %1301  ;;  %v824_v30 = vadd.f32 1.0, %v1300_v26 }
  0xde   : > { %v825_v31 = vadd.f32 1.0, %v1302_v29  ;;  %1307 = vtanh.f32 %v700_v27 }
  0xdf   : > { %v888_v32 = vmul.f32 0.5, %v824_v30  ;;  %1309 = vtanh.f32 %v701_v28  ;;  %v586_v34 = vpop.f32.mrf.mxu2 }
  0xe0   : > { %v889_v33 = vmul.f32 0.5, %v825_v31  ;;  %v651_v35 = vpop.f32.mrf.mxu3  ;;  %v1304_v36 = vpop.eup %1303  ;;  %v702_v37 = vmul.f32 0.5, %v586_v34 }
  0xe1   : > { %952 = vst [vmem:[%s1919_s21] sm:$0xff] %v888_v32  ;;  %v703_v38 = vmul.f32 0.5, %v651_v35  ;;  %v1306_v39 = vpop.eup %1305  ;;  %v826_v40 = vadd.f32 1.0, %v1304_v36 }
  0xe2   : > { %953 = vst [vmem:[%s1919_s21 + $0x8] sm:$0xff] %v889_v33  ;;  %v827_v41 = vadd.f32 1.0, %v1306_v39  ;;  %1311 = vtanh.f32 %v702_v37 }
  0xe3   : > { %v459_v42 = vpop.f32.mrf.mxu0  ;;  %v890_v45 = vmul.f32 0.5, %v826_v40  ;;  %1313 = vtanh.f32 %v703_v38 }
  0xe4   : > { %v524_v43 = vpop.f32.mrf.mxu1  ;;  %v1308_v44 = vpop.eup %1307  ;;  %v704_v46 = vmul.f32 0.5, %v459_v42  ;;  %v891_v49 = vmul.f32 0.5, %v827_v41 }
  0xe5   : > { %v705_v47 = vmul.f32 0.5, %v524_v43  ;;  %v1310_v48 = vpop.eup %1309  ;;  %v828_v50 = vadd.f32 1.0, %v1308_v44  ;;  %954 = vst [vmem:[%s1919_s21 + $0x10] sm:$0xff] %v890_v45 }
  0xe6   : > { %v829_v51 = vadd.f32 1.0, %v1310_v48  ;;  %1315 = vtanh.f32 %v704_v46  ;;  %955 = vst [vmem:[%s1919_s21 + $0x18] sm:$0xff] %v891_v49 }
  0xe7   : > { %v892_v52 = vmul.f32 0.5, %v828_v50  ;;  %1317 = vtanh.f32 %v705_v47  ;;  %v589_v54 = vpop.f32.mrf.mxu2 }
  0xe8   : > { %v893_v53 = vmul.f32 0.5, %v829_v51  ;;  %v654_v55 = vpop.f32.mrf.mxu3  ;;  %v1312_v56 = vpop.eup %1311  ;;  %v706_v57 = vmul.f32 0.5, %v589_v54 }
  0xe9   : > { %956 = vst [vmem:[%s1919_s21 + $0x20] sm:$0xff] %v892_v52  ;;  %v707_v58 = vmul.f32 0.5, %v654_v55  ;;  %v1314_v59 = vpop.eup %1313  ;;  %v830_v60 = vadd.f32 1.0, %v1312_v56 }
  0xea   : > { %957 = vst [vmem:[%s1919_s21 + $0x28] sm:$0xff] %v893_v53  ;;  %v831_v61 = vadd.f32 1.0, %v1314_v59  ;;  %1319 = vtanh.f32 %v706_v57 }
  0xeb   : > { %v462_v62 = vpop.f32.mrf.mxu0  ;;  %v894_v1 = vmul.f32 0.5, %v830_v60  ;;  %1321 = vtanh.f32 %v707_v58 }
  0xec   : > { %v527_v63 = vpop.f32.mrf.mxu1  ;;  %v1316_v0 = vpop.eup %1315  ;;  %v708_v2 = vmul.f32 0.5, %v462_v62  ;;  %v895_v5 = vmul.f32 0.5, %v831_v61 }
  0xed   : > { %v709_v3 = vmul.f32 0.5, %v527_v63  ;;  %v1318_v4 = vpop.eup %1317  ;;  %v832_v6 = vadd.f32 1.0, %v1316_v0  ;;  %958 = vst [vmem:[%s1919_s21 + $0x30] sm:$0xff] %v894_v1 }
  0xee   : > { %v833_v7 = vadd.f32 1.0, %v1318_v4  ;;  %1323 = vtanh.f32 %v708_v2  ;;  %959 = vst [vmem:[%s1919_s21 + $0x38] sm:$0xff] %v895_v5 }
  0xef   : > { %v896_v8 = vmul.f32 0.5, %v832_v6  ;;  %1325 = vtanh.f32 %v709_v3  ;;  %v592_v10 = vpop.f32.mrf.mxu2 }
  0xf0   : > { %v897_v9 = vmul.f32 0.5, %v833_v7  ;;  %v657_v11 = vpop.f32.mrf.mxu3  ;;  %v1320_v12 = vpop.eup %1319  ;;  %v710_v13 = vmul.f32 0.5, %v592_v10 }
  0xf1   : > { %960 = vst [vmem:[%s1919_s21 + $0x40] sm:$0xff] %v896_v8  ;;  %v711_v14 = vmul.f32 0.5, %v657_v11  ;;  %v1322_v15 = vpop.eup %1321  ;;  %v834_v16 = vadd.f32 1.0, %v1320_v12 }
  0xf2   : > { %961 = vst [vmem:[%s1919_s21 + $0x48] sm:$0xff] %v897_v9  ;;  %v835_v17 = vadd.f32 1.0, %v1322_v15  ;;  %1327 = vtanh.f32 %v710_v13 }
  0xf3   : > { %v465_v18 = vpop.f32.mrf.mxu0  ;;  %v898_v21 = vmul.f32 0.5, %v834_v16  ;;  %1329 = vtanh.f32 %v711_v14 }
  0xf4   : > { %v530_v19 = vpop.f32.mrf.mxu1  ;;  %v1324_v20 = vpop.eup %1323  ;;  %v712_v22 = vmul.f32 0.5, %v465_v18  ;;  %v899_v25 = vmul.f32 0.5, %v835_v17 }
  0xf5   : > { %v713_v23 = vmul.f32 0.5, %v530_v19  ;;  %v1326_v24 = vpop.eup %1325  ;;  %v836_v26 = vadd.f32 1.0, %v1324_v20  ;;  %962 = vst [vmem:[%s1919_s21 + $0x50] sm:$0xff] %v898_v21 }
  0xf6   : > { %v837_v27 = vadd.f32 1.0, %v1326_v24  ;;  %1331 = vtanh.f32 %v712_v22  ;;  %963 = vst [vmem:[%s1919_s21 + $0x58] sm:$0xff] %v899_v25 }
  0xf7   : > { %v900_v28 = vmul.f32 0.5, %v836_v26  ;;  %1333 = vtanh.f32 %v713_v23  ;;  %v595_v30 = vpop.f32.mrf.mxu2 }
  0xf8   : > { %v901_v29 = vmul.f32 0.5, %v837_v27  ;;  %v660_v31 = vpop.f32.mrf.mxu3  ;;  %v1328_v32 = vpop.eup %1327  ;;  %v714_v33 = vmul.f32 0.5, %v595_v30 }
  0xf9   : > { %964 = vst [vmem:[%s1919_s21 + $0x60] sm:$0xff] %v900_v28  ;;  %v715_v34 = vmul.f32 0.5, %v660_v31  ;;  %v1330_v35 = vpop.eup %1329  ;;  %v838_v36 = vadd.f32 1.0, %v1328_v32 }
  0xfa   : > { %965 = vst [vmem:[%s1919_s21 + $0x68] sm:$0xff] %v901_v29  ;;  %v839_v37 = vadd.f32 1.0, %v1330_v35  ;;  %1335 = vtanh.f32 %v714_v33 }
  0xfb   : > { %v468_v38 = vpop.f32.mrf.mxu0  ;;  %v902_v41 = vmul.f32 0.5, %v838_v36  ;;  %1337 = vtanh.f32 %v715_v34 }
  0xfc   : > { %v533_v39 = vpop.f32.mrf.mxu1  ;;  %v1332_v40 = vpop.eup %1331  ;;  %v716_v42 = vmul.f32 0.5, %v468_v38  ;;  %v903_v45 = vmul.f32 0.5, %v839_v37 }
  0xfd   : > { %v717_v43 = vmul.f32 0.5, %v533_v39  ;;  %v1334_v44 = vpop.eup %1333  ;;  %v840_v46 = vadd.f32 1.0, %v1332_v40  ;;  %966 = vst [vmem:[%s1919_s21 + $0x70] sm:$0xff] %v902_v41 }
  0xfe   : > { %v841_v47 = vadd.f32 1.0, %v1334_v44  ;;  %1339 = vtanh.f32 %v716_v42  ;;  %967 = vst [vmem:[%s1919_s21 + $0x78] sm:$0xff] %v903_v45 }
  0xff   : > { %v904_v48 = vmul.f32 0.5, %v840_v46  ;;  %1341 = vtanh.f32 %v717_v43  ;;  %v598_v50 = vpop.f32.mrf.mxu2 }
 0x100   : > { %v905_v49 = vmul.f32 0.5, %v841_v47  ;;  %v663_v51 = vpop.f32.mrf.mxu3  ;;  %v1336_v52 = vpop.eup %1335  ;;  %v718_v53 = vmul.f32 0.5, %v598_v50 }
 0x101   : > { %968 = vst [vmem:[%s1919_s21 + $0x80] sm:$0xff] %v904_v48  ;;  %v719_v54 = vmul.f32 0.5, %v663_v51  ;;  %v1338_v55 = vpop.eup %1337  ;;  %v842_v56 = vadd.f32 1.0, %v1336_v52 }
 0x102   : > { %969 = vst [vmem:[%s1919_s21 + $0x88] sm:$0xff] %v905_v49  ;;  %v843_v57 = vadd.f32 1.0, %v1338_v55  ;;  %1343 = vtanh.f32 %v718_v53 }
 0x103   : > { %v471_v58 = vpop.f32.mrf.mxu0  ;;  %v906_v61 = vmul.f32 0.5, %v842_v56  ;;  %1345 = vtanh.f32 %v719_v54 }
 0x104   : > { %v536_v59 = vpop.f32.mrf.mxu1  ;;  %v1340_v60 = vpop.eup %1339  ;;  %v720_v62 = vmul.f32 0.5, %v471_v58  ;;  %v907_v1 = vmul.f32 0.5, %v843_v57 }
 0x105   : > { %v721_v63 = vmul.f32 0.5, %v536_v59  ;;  %v1342_v0 = vpop.eup %1341  ;;  %v844_v2 = vadd.f32 1.0, %v1340_v60  ;;  %970 = vst [vmem:[%s1919_s21 + $0x90] sm:$0xff] %v906_v61 }
 0x106   : > { %v845_v3 = vadd.f32 1.0, %v1342_v0  ;;  %1347 = vtanh.f32 %v720_v62  ;;  %971 = vst [vmem:[%s1919_s21 + $0x98] sm:$0xff] %v907_v1 }
 0x107   : > { %v908_v4 = vmul.f32 0.5, %v844_v2  ;;  %1349 = vtanh.f32 %v721_v63  ;;  %v601_v6 = vpop.f32.mrf.mxu2 }
 0x108   : > { %v909_v5 = vmul.f32 0.5, %v845_v3  ;;  %v666_v7 = vpop.f32.mrf.mxu3  ;;  %v1344_v8 = vpop.eup %1343  ;;  %v722_v9 = vmul.f32 0.5, %v601_v6 }
 0x109   : > { %972 = vst [vmem:[%s1919_s21 + $0xa0] sm:$0xff] %v908_v4  ;;  %v723_v10 = vmul.f32 0.5, %v666_v7  ;;  %v1346_v11 = vpop.eup %1345  ;;  %v846_v12 = vadd.f32 1.0, %v1344_v8 }
 0x10a   : > { %973 = vst [vmem:[%s1919_s21 + $0xa8] sm:$0xff] %v909_v5  ;;  %v847_v13 = vadd.f32 1.0, %v1346_v11  ;;  %1351 = vtanh.f32 %v722_v9 }
 0x10b   : > { %v474_v14 = vpop.f32.mrf.mxu0  ;;  %v910_v17 = vmul.f32 0.5, %v846_v12  ;;  %1353 = vtanh.f32 %v723_v10 }
 0x10c   : > { %v539_v15 = vpop.f32.mrf.mxu1  ;;  %v1348_v16 = vpop.eup %1347  ;;  %v724_v18 = vmul.f32 0.5, %v474_v14  ;;  %v911_v21 = vmul.f32 0.5, %v847_v13 }
 0x10d   : > { %v725_v19 = vmul.f32 0.5, %v539_v15  ;;  %v1350_v20 = vpop.eup %1349  ;;  %v848_v22 = vadd.f32 1.0, %v1348_v16  ;;  %974 = vst [vmem:[%s1919_s21 + $0xb0] sm:$0xff] %v910_v17 }
 0x10e   : > { %v849_v23 = vadd.f32 1.0, %v1350_v20  ;;  %1355 = vtanh.f32 %v724_v18  ;;  %975 = vst [vmem:[%s1919_s21 + $0xb8] sm:$0xff] %v911_v21 }
 0x10f   : > { %v912_v24 = vmul.f32 0.5, %v848_v22  ;;  %1357 = vtanh.f32 %v725_v19  ;;  %v604_v26 = vpop.f32.mrf.mxu2 }
 0x110   : > { %v913_v25 = vmul.f32 0.5, %v849_v23  ;;  %v669_v27 = vpop.f32.mrf.mxu3  ;;  %v1352_v28 = vpop.eup %1351  ;;  %v726_v29 = vmul.f32 0.5, %v604_v26 }
 0x111   : > { %976 = vst [vmem:[%s1919_s21 + $0xc0] sm:$0xff] %v912_v24  ;;  %v727_v30 = vmul.f32 0.5, %v669_v27  ;;  %v1354_v31 = vpop.eup %1353  ;;  %v850_v32 = vadd.f32 1.0, %v1352_v28 }
 0x112   : > { %977 = vst [vmem:[%s1919_s21 + $0xc8] sm:$0xff] %v913_v25  ;;  %v851_v33 = vadd.f32 1.0, %v1354_v31  ;;  %1359 = vtanh.f32 %v726_v29 }
 0x113   : > { %v477_v34 = vpop.f32.mrf.mxu0  ;;  %v914_v37 = vmul.f32 0.5, %v850_v32  ;;  %1361 = vtanh.f32 %v727_v30 }
 0x114   : > { %v542_v35 = vpop.f32.mrf.mxu1  ;;  %v1356_v36 = vpop.eup %1355  ;;  %v728_v38 = vmul.f32 0.5, %v477_v34  ;;  %v915_v41 = vmul.f32 0.5, %v851_v33 }
 0x115   : > { %v729_v39 = vmul.f32 0.5, %v542_v35  ;;  %v1358_v40 = vpop.eup %1357  ;;  %v852_v42 = vadd.f32 1.0, %v1356_v36  ;;  %978 = vst [vmem:[%s1919_s21 + $0xd0] sm:$0xff] %v914_v37 }
 0x116   : > { %v853_v43 = vadd.f32 1.0, %v1358_v40  ;;  %1363 = vtanh.f32 %v728_v38  ;;  %979 = vst [vmem:[%s1919_s21 + $0xd8] sm:$0xff] %v915_v41 }
 0x117   : > { %v916_v44 = vmul.f32 0.5, %v852_v42  ;;  %1365 = vtanh.f32 %v729_v39  ;;  %v607_v46 = vpop.f32.mrf.mxu2 }
 0x118   : > { %v917_v45 = vmul.f32 0.5, %v853_v43  ;;  %v672_v47 = vpop.f32.mrf.mxu3  ;;  %v1360_v48 = vpop.eup %1359  ;;  %v730_v49 = vmul.f32 0.5, %v607_v46 }
 0x119   : > { %980 = vst [vmem:[%s1919_s21 + $0xe0] sm:$0xff] %v916_v44  ;;  %v731_v50 = vmul.f32 0.5, %v672_v47  ;;  %v1362_v51 = vpop.eup %1361  ;;  %v854_v52 = vadd.f32 1.0, %v1360_v48 }
 0x11a   : > { %981 = vst [vmem:[%s1919_s21 + $0xe8] sm:$0xff] %v917_v45  ;;  %v855_v53 = vadd.f32 1.0, %v1362_v51  ;;  %1367 = vtanh.f32 %v730_v49 }
 0x11b   : > { %v480_v54 = vpop.f32.mrf.mxu0  ;;  %v918_v57 = vmul.f32 0.5, %v854_v52  ;;  %1369 = vtanh.f32 %v731_v50 }
 0x11c   : > { %v545_v55 = vpop.f32.mrf.mxu1  ;;  %v1364_v56 = vpop.eup %1363  ;;  %v732_v58 = vmul.f32 0.5, %v480_v54  ;;  %v919_v61 = vmul.f32 0.5, %v855_v53 }
 0x11d   : > { %v733_v59 = vmul.f32 0.5, %v545_v55  ;;  %v1366_v60 = vpop.eup %1365  ;;  %v856_v62 = vadd.f32 1.0, %v1364_v56  ;;  %982 = vst [vmem:[%s1919_s21 + $0xf0] sm:$0xff] %v918_v57 }
 0x11e   : > { %v857_v63 = vadd.f32 1.0, %v1366_v60  ;;  %1371 = vtanh.f32 %v732_v58  ;;  %983 = vst [vmem:[%s1919_s21 + $0xf8] sm:$0xff] %v919_v61 }
 0x11f   : > { %v920_v0 = vmul.f32 0.5, %v856_v62  ;;  %1373 = vtanh.f32 %v733_v59  ;;  %v610_v2 = vpop.f32.mrf.mxu2 }
 0x120   : > { %v921_v1 = vmul.f32 0.5, %v857_v63  ;;  %v675_v3 = vpop.f32.mrf.mxu3  ;;  %v1368_v4 = vpop.eup %1367  ;;  %v734_v5 = vmul.f32 0.5, %v610_v2 }
 0x121   : > { %984 = vst [vmem:[%s1919_s21 + $0x100] sm:$0xff] %v920_v0  ;;  %v735_v6 = vmul.f32 0.5, %v675_v3  ;;  %v1370_v7 = vpop.eup %1369  ;;  %v858_v8 = vadd.f32 1.0, %v1368_v4 }
 0x122   : > { %985 = vst [vmem:[%s1919_s21 + $0x108] sm:$0xff] %v921_v1  ;;  %v859_v9 = vadd.f32 1.0, %v1370_v7  ;;  %1375 = vtanh.f32 %v734_v5 }
 0x123   : > { %v483_v10 = vpop.f32.mrf.mxu0  ;;  %v922_v13 = vmul.f32 0.5, %v858_v8  ;;  %1377 = vtanh.f32 %v735_v6 }
 0x124   : > { %v548_v11 = vpop.f32.mrf.mxu1  ;;  %v1372_v12 = vpop.eup %1371  ;;  %v736_v14 = vmul.f32 0.5, %v483_v10  ;;  %v923_v17 = vmul.f32 0.5, %v859_v9 }
 0x125   : > { %v737_v15 = vmul.f32 0.5, %v548_v11  ;;  %v1374_v16 = vpop.eup %1373  ;;  %v860_v18 = vadd.f32 1.0, %v1372_v12  ;;  %986 = vst [vmem:[%s1919_s21 + $0x110] sm:$0xff] %v922_v13 }
 0x126   : > { %v861_v19 = vadd.f32 1.0, %v1374_v16  ;;  %1379 = vtanh.f32 %v736_v14  ;;  %987 = vst [vmem:[%s1919_s21 + $0x118] sm:$0xff] %v923_v17 }
 0x127   : > { %v924_v20 = vmul.f32 0.5, %v860_v18  ;;  %1381 = vtanh.f32 %v737_v15  ;;  %v613_v22 = vpop.f32.mrf.mxu2 }
 0x128   : > { %v925_v21 = vmul.f32 0.5, %v861_v19  ;;  %v678_v23 = vpop.f32.mrf.mxu3  ;;  %v1376_v24 = vpop.eup %1375  ;;  %v738_v25 = vmul.f32 0.5, %v613_v22 }
 0x129   : > { %988 = vst [vmem:[%s1919_s21 + $0x120] sm:$0xff] %v924_v20  ;;  %v739_v26 = vmul.f32 0.5, %v678_v23  ;;  %v1378_v27 = vpop.eup %1377  ;;  %v862_v28 = vadd.f32 1.0, %v1376_v24 }
 0x12a   : > { %989 = vst [vmem:[%s1919_s21 + $0x128] sm:$0xff] %v925_v21  ;;  %v863_v29 = vadd.f32 1.0, %v1378_v27  ;;  %1383 = vtanh.f32 %v738_v25 }
 0x12b   : > { %v486_v30 = vpop.f32.mrf.mxu0  ;;  %v926_v33 = vmul.f32 0.5, %v862_v28  ;;  %1385 = vtanh.f32 %v739_v26 }
 0x12c   : > { %v551_v31 = vpop.f32.mrf.mxu1  ;;  %v1380_v32 = vpop.eup %1379  ;;  %v740_v34 = vmul.f32 0.5, %v486_v30  ;;  %v927_v37 = vmul.f32 0.5, %v863_v29 }
 0x12d   : > { %v741_v35 = vmul.f32 0.5, %v551_v31  ;;  %v1382_v36 = vpop.eup %1381  ;;  %v864_v38 = vadd.f32 1.0, %v1380_v32  ;;  %990 = vst [vmem:[%s1919_s21 + $0x130] sm:$0xff] %v926_v33 }
 0x12e   : > { %v865_v39 = vadd.f32 1.0, %v1382_v36  ;;  %1387 = vtanh.f32 %v740_v34  ;;  %991 = vst [vmem:[%s1919_s21 + $0x138] sm:$0xff] %v927_v37 }
 0x12f   : > { %v928_v40 = vmul.f32 0.5, %v864_v38  ;;  %1389 = vtanh.f32 %v741_v35  ;;  %v616_v42 = vpop.f32.mrf.mxu2 }
 0x130   : > { %v929_v41 = vmul.f32 0.5, %v865_v39  ;;  %v681_v43 = vpop.f32.mrf.mxu3  ;;  %v1384_v44 = vpop.eup %1383  ;;  %v742_v45 = vmul.f32 0.5, %v616_v42 }
 0x131   : > { %992 = vst [vmem:[%s1919_s21 + $0x140] sm:$0xff] %v928_v40  ;;  %v743_v46 = vmul.f32 0.5, %v681_v43  ;;  %v1386_v47 = vpop.eup %1385  ;;  %v866_v48 = vadd.f32 1.0, %v1384_v44 }
 0x132   : > { %993 = vst [vmem:[%s1919_s21 + $0x148] sm:$0xff] %v929_v41  ;;  %v867_v49 = vadd.f32 1.0, %v1386_v47  ;;  %1391 = vtanh.f32 %v742_v45 }
 0x133   : > { %v489_v50 = vpop.f32.mrf.mxu0  ;;  %v930_v53 = vmul.f32 0.5, %v866_v48  ;;  %1393 = vtanh.f32 %v743_v46 }
 0x134   : > { %v554_v51 = vpop.f32.mrf.mxu1  ;;  %v1388_v52 = vpop.eup %1387  ;;  %v744_v54 = vmul.f32 0.5, %v489_v50  ;;  %v931_v57 = vmul.f32 0.5, %v867_v49 }
 0x135   : > { %v745_v55 = vmul.f32 0.5, %v554_v51  ;;  %v1390_v56 = vpop.eup %1389  ;;  %v868_v58 = vadd.f32 1.0, %v1388_v52  ;;  %994 = vst [vmem:[%s1919_s21 + $0x150] sm:$0xff] %v930_v53 }
 0x136   : > { %v869_v59 = vadd.f32 1.0, %v1390_v56  ;;  %1395 = vtanh.f32 %v744_v54  ;;  %995 = vst [vmem:[%s1919_s21 + $0x158] sm:$0xff] %v931_v57 }
 0x137   : > { %v932_v60 = vmul.f32 0.5, %v868_v58  ;;  %1397 = vtanh.f32 %v745_v55  ;;  %v619_v62 = vpop.f32.mrf.mxu2 }
 0x138   : > { %v933_v61 = vmul.f32 0.5, %v869_v59  ;;  %v684_v63 = vpop.f32.mrf.mxu3  ;;  %v1392_v0 = vpop.eup %1391  ;;  %v746_v1 = vmul.f32 0.5, %v619_v62 }
 0x139   : > { %996 = vst [vmem:[%s1919_s21 + $0x160] sm:$0xff] %v932_v60  ;;  %v747_v2 = vmul.f32 0.5, %v684_v63  ;;  %v1394_v3 = vpop.eup %1393  ;;  %v870_v4 = vadd.f32 1.0, %v1392_v0 }
 0x13a   : > { %997 = vst [vmem:[%s1919_s21 + $0x168] sm:$0xff] %v933_v61  ;;  %v871_v5 = vadd.f32 1.0, %v1394_v3  ;;  %1399 = vtanh.f32 %v746_v1 }
 0x13b   : > { %v492_v6 = vpop.f32.mrf.mxu0  ;;  %v934_v9 = vmul.f32 0.5, %v870_v4  ;;  %1401 = vtanh.f32 %v747_v2 }
 0x13c   : > { %v557_v7 = vpop.f32.mrf.mxu1  ;;  %v1396_v8 = vpop.eup %1395  ;;  %v748_v10 = vmul.f32 0.5, %v492_v6  ;;  %v935_v13 = vmul.f32 0.5, %v871_v5 }
 0x13d   : > { %v749_v11 = vmul.f32 0.5, %v557_v7  ;;  %v1398_v12 = vpop.eup %1397  ;;  %v872_v14 = vadd.f32 1.0, %v1396_v8  ;;  %998 = vst [vmem:[%s1919_s21 + $0x170] sm:$0xff] %v934_v9 }
 0x13e   : > { %v873_v15 = vadd.f32 1.0, %v1398_v12  ;;  %1403 = vtanh.f32 %v748_v10  ;;  %999 = vst [vmem:[%s1919_s21 + $0x178] sm:$0xff] %v935_v13 }
 0x13f   : > { %v936_v16 = vmul.f32 0.5, %v872_v14  ;;  %1405 = vtanh.f32 %v749_v11  ;;  %v622_v18 = vpop.f32.mrf.mxu2 }
 0x140   : > { %v937_v17 = vmul.f32 0.5, %v873_v15  ;;  %v687_v19 = vpop.f32.mrf.mxu3  ;;  %v1400_v20 = vpop.eup %1399  ;;  %v750_v21 = vmul.f32 0.5, %v622_v18 }
 0x141   : > { %1000 = vst [vmem:[%s1919_s21 + $0x180] sm:$0xff] %v936_v16  ;;  %v751_v22 = vmul.f32 0.5, %v687_v19  ;;  %v1402_v23 = vpop.eup %1401  ;;  %v874_v24 = vadd.f32 1.0, %v1400_v20 }
 0x142   : > { %1001 = vst [vmem:[%s1919_s21 + $0x188] sm:$0xff] %v937_v17  ;;  %v875_v25 = vadd.f32 1.0, %v1402_v23  ;;  %1407 = vtanh.f32 %v750_v21 }
 0x143   : > { %v495_v26 = vpop.f32.mrf.mxu0  ;;  %v938_v29 = vmul.f32 0.5, %v874_v24  ;;  %1409 = vtanh.f32 %v751_v22 }
 0x144   : > { %v560_v27 = vpop.f32.mrf.mxu1  ;;  %v1404_v28 = vpop.eup %1403  ;;  %v752_v30 = vmul.f32 0.5, %v495_v26  ;;  %v939_v33 = vmul.f32 0.5, %v875_v25 }
 0x145   : > { %v753_v31 = vmul.f32 0.5, %v560_v27  ;;  %v1406_v32 = vpop.eup %1405  ;;  %v876_v34 = vadd.f32 1.0, %v1404_v28  ;;  %1002 = vst [vmem:[%s1919_s21 + $0x190] sm:$0xff] %v938_v29 }
 0x146   : > { %v877_v35 = vadd.f32 1.0, %v1406_v32  ;;  %1411 = vtanh.f32 %v752_v30  ;;  %1003 = vst [vmem:[%s1919_s21 + $0x198] sm:$0xff] %v939_v33 }
 0x147   : > { %v940_v36 = vmul.f32 0.5, %v876_v34  ;;  %1413 = vtanh.f32 %v753_v31  ;;  %v625_v38 = vpop.f32.mrf.mxu2 }
 0x148   : > { %v941_v37 = vmul.f32 0.5, %v877_v35  ;;  %v690_v39 = vpop.f32.mrf.mxu3  ;;  %v1408_v40 = vpop.eup %1407  ;;  %v754_v41 = vmul.f32 0.5, %v625_v38 }
 0x149   : > { %1004 = vst [vmem:[%s1919_s21 + $0x1a0] sm:$0xff] %v940_v36  ;;  %v755_v42 = vmul.f32 0.5, %v690_v39  ;;  %v1410_v43 = vpop.eup %1409  ;;  %v878_v44 = vadd.f32 1.0, %v1408_v40 }
 0x14a   : > { %1005 = vst [vmem:[%s1919_s21 + $0x1a8] sm:$0xff] %v941_v37  ;;  %v879_v45 = vadd.f32 1.0, %v1410_v43  ;;  %1415 = vtanh.f32 %v754_v41 }
 0x14b   : > { %v498_v46 = vpop.f32.mrf.mxu0  ;;  %v942_v49 = vmul.f32 0.5, %v878_v44  ;;  %1417 = vtanh.f32 %v755_v42 }
 0x14c   : > { %v563_v47 = vpop.f32.mrf.mxu1  ;;  %v1412_v48 = vpop.eup %1411  ;;  %v756_v50 = vmul.f32 0.5, %v498_v46  ;;  %v943_v53 = vmul.f32 0.5, %v879_v45 }
 0x14d   : > { %v757_v51 = vmul.f32 0.5, %v563_v47  ;;  %v1414_v52 = vpop.eup %1413  ;;  %v880_v54 = vadd.f32 1.0, %v1412_v48  ;;  %1006 = vst [vmem:[%s1919_s21 + $0x1b0] sm:$0xff] %v942_v49 }
 0x14e   : > { %v881_v55 = vadd.f32 1.0, %v1414_v52  ;;  %1419 = vtanh.f32 %v756_v50  ;;  %1007 = vst [vmem:[%s1919_s21 + $0x1b8] sm:$0xff] %v943_v53 }
 0x14f   : > { %v944_v56 = vmul.f32 0.5, %v880_v54  ;;  %1421 = vtanh.f32 %v757_v51  ;;  %v628_v58 = vpop.f32.mrf.mxu2 }
 0x150   : > { %v945_v57 = vmul.f32 0.5, %v881_v55  ;;  %v693_v59 = vpop.f32.mrf.mxu3  ;;  %v1416_v60 = vpop.eup %1415  ;;  %v758_v61 = vmul.f32 0.5, %v628_v58 }
 0x151   : > { %1008 = vst [vmem:[%s1919_s21 + $0x1c0] sm:$0xff] %v944_v56  ;;  %v759_v62 = vmul.f32 0.5, %v693_v59  ;;  %v1418_v63 = vpop.eup %1417  ;;  %v882_v0 = vadd.f32 1.0, %v1416_v60 }
 0x152   : > { %1009 = vst [vmem:[%s1919_s21 + $0x1c8] sm:$0xff] %v945_v57  ;;  %v883_v1 = vadd.f32 1.0, %v1418_v63  ;;  %1423 = vtanh.f32 %v758_v61 }
 0x153   : > { %v946_v3 = vmul.f32 0.5, %v882_v0  ;;  %1425 = vtanh.f32 %v759_v62 }
 0x154   : > { %v1420_v2 = vpop.eup %1419  ;;  %v947_v5 = vmul.f32 0.5, %v883_v1 }
 0x155   : > { %v1422_v4 = vpop.eup %1421  ;;  %v884_v6 = vadd.f32 1.0, %v1420_v2  ;;  %1010 = vst [vmem:[%s1919_s21 + $0x1d0] sm:$0xff] %v946_v3 }
 0x156   : > { %v885_v7 = vadd.f32 1.0, %v1422_v4  ;;  %1011 = vst [vmem:[%s1919_s21 + $0x1d8] sm:$0xff] %v947_v5 }
 0x157   : > { %v948_v8 = vmul.f32 0.5, %v884_v6 }
 0x158   : > { %v949_v9 = vmul.f32 0.5, %v885_v7  ;;  %v1424_v10 = vpop.eup %1423 }
 0x159   : > { %1012 = vst [vmem:[%s1919_s21 + $0x1e0] sm:$0xff] %v948_v8  ;;  %v1426_v11 = vpop.eup %1425  ;;  %v886_v12 = vadd.f32 1.0, %v1424_v10 }
 0x15a   : > { %1013 = vst [vmem:[%s1919_s21 + $0x1e8] sm:$0xff] %v949_v9  ;;  %v887_v13 = vadd.f32 1.0, %v1426_v11 }
 0x15b   : > { %v950_v14 = vmul.f32 0.5, %v886_v12 }
 0x15c   : > { %v951_v15 = vmul.f32 0.5, %v887_v13 }
 0x15d   : > { %1014 = vst [vmem:[%s1919_s21 + $0x1f0] sm:$0xff] %v950_v14 }
 0x15e   : > { %1015 = vst [vmem:[%s1919_s21 + $0x1f8] sm:$0xff] %v951_v15 }
 0x15f   : > { %1454 = shalt.err (!%p1451_p3)
}
 0x160   : > { %s1507_s12 = smov 512   ;;  %s1508_s13 = smov 32  }
 0x161   : > { %1242 = dma.vmem_to_hbm [thread:$0]  (%p1559_p4), %s1033_s9, 8192, %s1035_s26, %s1017_s27, %s1507_s12, %s1507_s12, %s1508_s13  }
 0x162 PF: > { %p1248_p5 = scmp.ge.s32.totalorder %s1505_s11, 2  ;;  %s1049_s15 = sand.u32 1, %s1485_s6  }
 0x163   : > { %s1050_s17 = scalar_lea.sflag [#allocation3], %s1049_s15 }
 0x164   : > { %p1245_p6 = pnand %p1248_p5, %p1566_p8 }
 0x166   : > { %p1246_p7 = pneg %p1245_p6 }
 0x168   : > { %1480 = dma.done.wait (%p1246_p7), %s1050_s17, 8192  }
 0x169   : > { %1482 = vsyncadd (%p1246_p7), %s1050_s17, 4294959104  ;;  %s14_s11 = sadd.s32 1, %s1505_s11   ;;  %s2028_s6 = smov %s1489_s7 }
 0x16a   : > { %p11_p9 = scmp.ge.s32.totalorder %s14_s11, 4   ;;  %s2029_s7 = smov %s1493_s8 }
 0x16b   : > { %s2030_s8 = smov %s1572_s19  ;;  %s2031_s9 = smov %s1501_s10 }
 0x16c   : > { %s2032_s10 = smov %s2034_s14  ;;  %13 = sbr.rel (!%p11_p9) target bundleno = 4 (0x4), region = 58 }
 0x171   :  { %1056 = vsyncpa [#allocation3], 1 }
 0x172   :  { %1058 = vsyncpa [#allocation3 + $0x1], 1 }

// kernel: tpu_custom_call.1
= control target key start
LH: loop header
LB: loop body
LE: loop exit
PB: predicated region body
PF: predicated region fallthrough
CT: control target
= control target key end

     0   :  { %6 = vsyncpa [#allocation3], 0  ;;  %s2024_s0 = inlined_call_operand.vmem [shape: f32[512,32], index: 0, kind: input, shape index: {}]   ;;  %s2025_s1 = inlined_call_operand.hbm [shape: f32[256,512], index: 1, kind: output, shape index: {}]  }
   0x1   :  { %8 = vsyncpa [#allocation3 + $0x1], 0  ;;  %s1519_s6 = smov 0   ;;  %s1521_s7 = smov 0  }
   0x2   :  { %s1523_s8 = smov 0   ;;  %s1525_s9 = smov 0  }
   0x3   :  { %s1527_s10 = smov 0   ;;  %s1529_s11 = smov 0  }
   0x4 LB: > { %s1100_s12 = sadd.s32 4294967295, %s1505_s11   ;;  %s1101_s13 = sadd.s32 4294967294, %s1505_s11   ;;  %s1505_s11 = sphi %s1529_s11, %s14_s11   ;;  %s1501_s10 = sphi %s1527_s10, %s2032_s10   ;;  %s1497_s9 = sphi %s1525_s9, %s2031_s9   ;;  %s1493_s8 = sphi %s1523_s8, %s2030_s8   ;;  %s1489_s7 = sphi %s1521_s7, %s2029_s7   ;;  %s1485_s6 = sphi %s1519_s6, %s2028_s6  }
   0x5   : > { %s26_s14 = sadd.s32 1, %s1501_s10  ;;  %s56_s15 = sadd.s32 1, %s1493_s8 }
   0x6   : > { %p28_p0 = scmp.ge.s32.totalorder %s26_s14, 2  ;;  %p66_p1 = scmp.ne.s32.totalorder %s1493_s8, %s1489_s7 }
   0x7   : > { %p67_p2 = scmp.eq.s32.totalorder %s1100_s12, 1  ;;  %p72_p3 = scmp.ne.s32.totalorder %s1489_s7, %s1485_s6 }
   0x8   : > { %s2034_s14 = smov (%p28_p0, %s26_s14), 0  ;;  %p73_p5 = scmp.eq.s32.totalorder %s1101_s13, 1 }
   0x9   : > { %p1559_p4 = por %p67_p2, %p66_p1  ;;  %s51_s17 = ssub.s32 %s1501_s10, %s2034_s14 }
   0xa   : > { %p1103_p6 = scmp.ge.s32.totalorder %s1505_s11, 1  ;;  %p54_p7 = scmp.eq.s32.totalorder %s51_s17, 0 }
   0xb   : > { %p1566_p8 = por %p73_p5, %p72_p3  ;;  %p94_p9 = scmp.lt.s32.totalorder %s1505_s11, 3 }
   0xc   : > { %s1572_s19 = scalar_select %p54_p7, %s1493_s8, %s56_s15  }
   0xd   : > { %p95_p10 = pnand %p1103_p6, %p94_p9 }
   0xe   : > { %s1105_s26 = sshll.u32 (!%p95_p10), %s1497_s9, 7  ;;  %s106_s17 = sand.u32 (!%p95_p10), 1, %s1489_s7  }
   0xf   : > { %98 = sbr.rel (%p95_p10) target bundleno = 354 (0x162), region = 24  ;;  %s1824_s4 = scalar_lea.vmem (!%p95_p10), %s2024_s0, %s1105_s26 }
  0x10   : > { %s1104_s20 = sshll.u32 (!%p95_p10), %s106_s17, 9  ;;  %s1241_s22 = sshll.u32 (!%p95_p10), %s1497_s9, 9 }
  0x11   : > { %s1919_s21 = scalar_lea.vmem (!%p95_p10), [#allocation2], %s1104_s20  ;;  %s1031_s25 = scalar_lea.hbm (!%p95_p10), %s2025_s1, %s1241_s22 }
  0x12   : > { %s1032_s9 = sshll.u32 (!%p95_p10), %s1919_s21, 4  ;;  %s1034_s26 = sshll.u32 (!%p95_p10), %s1031_s25, 4  ;;  %s1033_s9 = int_to_ptr.vmem [resolvable:$true] %s1032_s9  ;;  %s1035_s26 = int_to_ptr.hbm [resolvable:$true] %s1034_s26 }
  0x13   : > { %s1017_s27 = scalar_lea.sflag (!%p95_p10), [#allocation3], %s106_s17  ;;  %s1441_s28 = sshra.s32 (!%p95_p10), %s1035_s26, 4  ;;  %s1442_s28 = int_to_ptr.hbm [resolvable:$true] %s1441_s28 }
  0x14   : > { %v178_v0 = vld [vmem:[%s2024_s0 + $0x178] sm:$0xff]  ;;  %vm195_vm0 = vcmask 261120   ;;  %v177_v4 = vld [vmem:[%s2024_s0 + $0x170] sm:$0xff]  ;;  %v176_v8 = vld [vmem:[%s2024_s0 + $0x168] sm:$0xff]  ;;  %s1443_s29 = scalar_lea.hbm %s1442_s28, 512  ;;  %s1447_s3 = scalar_lea.hbm %s2025_s1, 1024 }
  0x15   : > { %v194_v1 = vld [vmem:[%s2024_s0 + $0x1f8] sm:$0xff]  ;;  %1170 = vmatpush.xpose.msk.msra.mxu2 %vm195_vm0, %v178_v0  ;;  %v193_v5 = vld [vmem:[%s2024_s0 + $0x1f0] sm:$0xff]  ;;  %v192_v9 = vld [vmem:[%s2024_s0 + $0x1e8] sm:$0xff]  ;;  %p1444_p11 = scmp.ne.s32.totalorder %s1442_s28, %s1443_s29  ;;  %p1448_p0 = scmp.lt.s32.totalorder %s1442_s28, %s2025_s1 }
  0x16   : > { %1202 = vmatpush.xpose.msk.msra.mxu3 %vm195_vm0, %v194_v1  ;;  %v146_v2 = vld [vmem:[%s2024_s0 + $0x78] sm:$0xff]  ;;  %v145_v6 = vld [vmem:[%s2024_s0 + $0x70] sm:$0xff]  ;;  %v144_v10 = vld [vmem:[%s2024_s0 + $0x68] sm:$0xff]  ;;  %p1449_p1 = scmp.lt.s32.totalorder %s1447_s3, %s1443_s29 }
  0x17   : > { %v162_v3 = vld [vmem:[%s2024_s0 + $0xf8] sm:$0xff]  ;;  %1106 = vmatpush.xpose.msk.msra.mxu0 %vm195_vm0, %v146_v2  ;;  %v161_v7 = vld [vmem:[%s2024_s0 + $0xf0] sm:$0xff]  ;;  %v160_v11 = vld [vmem:[%s2024_s0 + $0xe8] sm:$0xff]  ;;  %p1445_p12 = pnand %p1444_p11, %p1559_p4 }
  0x18   : > { %1138 = vmatpush.xpose.msk.msra.mxu1 %vm195_vm0, %v162_v3  ;;  %v175_v12 = vld [vmem:[%s2024_s0 + $0x160] sm:$0xff]  ;;  %v174_v16 = vld [vmem:[%s2024_s0 + $0x158] sm:$0xff]  ;;  %v173_v20 = vld [vmem:[%s2024_s0 + $0x150] sm:$0xff]  ;;  %p1450_p2 = por %p1449_p1, %p1448_p0 }
  0x19   : > { %1171 = vmatpush.xpose.msk.msra.mxu2 %vm195_vm0, %v177_v4  ;;  %v191_v13 = vld [vmem:[%s2024_s0 + $0x1e0] sm:$0xff]  ;;  %v190_v17 = vld [vmem:[%s2024_s0 + $0x1d8] sm:$0xff]  ;;  %v189_v21 = vld [vmem:[%s2024_s0 + $0x1d0] sm:$0xff]  ;;  %p1446_p13 = pneg %p1445_p12 }
  0x1a   : > { %1203 = vmatpush.xpose.msk.msra.mxu3 %vm195_vm0, %v193_v5  ;;  %v143_v14 = vld [vmem:[%s2024_s0 + $0x60] sm:$0xff]  ;;  %v142_v18 = vld [vmem:[%s2024_s0 + $0x58] sm:$0xff]  ;;  %v141_v22 = vld [vmem:[%s2024_s0 + $0x50] sm:$0xff] }
  0x1b   : > { %1107 = vmatpush.xpose.msk.msra.mxu0 %vm195_vm0, %v145_v6  ;;  %v159_v15 = vld [vmem:[%s2024_s0 + $0xe0] sm:$0xff]  ;;  %v158_v19 = vld [vmem:[%s2024_s0 + $0xd8] sm:$0xff]  ;;  %v157_v23 = vld [vmem:[%s2024_s0 + $0xd0] sm:$0xff]  ;;  %p1451_p3 = pnand %p1450_p2, %p1446_p13 }
  0x1c   : > { %1139 = vmatpush.xpose.msk.msra.mxu1 %vm195_vm0, %v161_v7  ;;  %v172_v24 = vld [vmem:[%s2024_s0 + $0x148] sm:$0xff]  ;;  %v171_v28 = vld [vmem:[%s2024_s0 + $0x140] sm:$0xff]  ;;  %v170_v32 = vld [vmem:[%s2024_s0 + $0x138] sm:$0xff] }
  0x1d   : > { %1172 = vmatpush.xpose.msk.msra.mxu2 %vm195_vm0, %v176_v8  ;;  %v188_v25 = vld [vmem:[%s2024_s0 + $0x1c8] sm:$0xff]  ;;  %v187_v29 = vld [vmem:[%s2024_s0 + $0x1c0] sm:$0xff]  ;;  %v186_v33 = vld [vmem:[%s2024_s0 + $0x1b8] sm:$0xff] }
  0x1e   : > { %1204 = vmatpush.xpose.msk.msra.mxu3 %vm195_vm0, %v192_v9  ;;  %v140_v26 = vld [vmem:[%s2024_s0 + $0x48] sm:$0xff]  ;;  %v139_v30 = vld [vmem:[%s2024_s0 + $0x40] sm:$0xff]  ;;  %v138_v34 = vld [vmem:[%s2024_s0 + $0x38] sm:$0xff] }
  0x1f   : > { %1108 = vmatpush.xpose.msk.msra.mxu0 %vm195_vm0, %v144_v10  ;;  %v156_v27 = vld [vmem:[%s2024_s0 + $0xc8] sm:$0xff]  ;;  %v155_v31 = vld [vmem:[%s2024_s0 + $0xc0] sm:$0xff]  ;;  %v154_v35 = vld [vmem:[%s2024_s0 + $0xb8] sm:$0xff] }
  0x20   : > { %1140 = vmatpush.xpose.msk.msra.mxu1 %vm195_vm0, %v160_v11  ;;  %v169_v36 = vld [vmem:[%s2024_s0 + $0x130] sm:$0xff]  ;;  %v168_v40 = vld [vmem:[%s2024_s0 + $0x128] sm:$0xff]  ;;  %v167_v44 = vld [vmem:[%s2024_s0 + $0x120] sm:$0xff] }
  0x21   : > { %1173 = vmatpush.xpose.msk.msra.mxu2 %vm195_vm0, %v175_v12  ;;  %v185_v37 = vld [vmem:[%s2024_s0 + $0x1b0] sm:$0xff]  ;;  %v184_v41 = vld [vmem:[%s2024_s0 + $0x1a8] sm:$0xff]  ;;  %v183_v45 = vld [vmem:[%s2024_s0 + $0x1a0] sm:$0xff] }
  0x22   : > { %1205 = vmatpush.xpose.msk.msra.mxu3 %vm195_vm0, %v191_v13  ;;  %v137_v38 = vld [vmem:[%s2024_s0 + $0x30] sm:$0xff]  ;;  %v136_v42 = vld [vmem:[%s2024_s0 + $0x28] sm:$0xff]  ;;  %v135_v46 = vld [vmem:[%s2024_s0 + $0x20] sm:$0xff] }
  0x23   : > { %1109 = vmatpush.xpose.msk.msra.mxu0 %vm195_vm0, %v143_v14  ;;  %v153_v39 = vld [vmem:[%s2024_s0 + $0xb0] sm:$0xff]  ;;  %v152_v43 = vld [vmem:[%s2024_s0 + $0xa8] sm:$0xff]  ;;  %v151_v47 = vld [vmem:[%s2024_s0 + $0xa0] sm:$0xff] }
  0x24   : > { %1141 = vmatpush.xpose.msk.msra.mxu1 %vm195_vm0, %v159_v15  ;;  %v166_v48 = vld [vmem:[%s2024_s0 + $0x118] sm:$0xff]  ;;  %v165_v52 = vld [vmem:[%s2024_s0 + $0x110] sm:$0xff]  ;;  %v164_v56 = vld [vmem:[%s2024_s0 + $0x108] sm:$0xff] }
  0x25   : > { %1174 = vmatpush.xpose.msk.msra.mxu2 %vm195_vm0, %v174_v16  ;;  %v182_v49 = vld [vmem:[%s2024_s0 + $0x198] sm:$0xff]  ;;  %v181_v53 = vld [vmem:[%s2024_s0 + $0x190] sm:$0xff]  ;;  %v180_v57 = vld [vmem:[%s2024_s0 + $0x188] sm:$0xff] }
  0x26   : > { %1206 = vmatpush.xpose.msk.msra.mxu3 %vm195_vm0, %v190_v17  ;;  %v134_v50 = vld [vmem:[%s2024_s0 + $0x18] sm:$0xff]  ;;  %v133_v54 = vld [vmem:[%s2024_s0 + $0x10] sm:$0xff]  ;;  %v132_v58 = vld [vmem:[%s2024_s0 + $0x8] sm:$0xff] }
  0x27   : > { %1110 = vmatpush.xpose.msk.msra.mxu0 %vm195_vm0, %v142_v18  ;;  %v150_v51 = vld [vmem:[%s2024_s0 + $0x98] sm:$0xff]  ;;  %v149_v55 = vld [vmem:[%s2024_s0 + $0x90] sm:$0xff]  ;;  %v148_v59 = vld [vmem:[%s2024_s0 + $0x88] sm:$0xff] }
  0x28   : > { %1142 = vmatpush.xpose.msk.msra.mxu1 %vm195_vm0, %v158_v19  ;;  %v163_v60 = vld [vmem:[%s2024_s0 + $0x100] sm:$0xff]  ;;  %v114_v1 = vld [vmem:[%s1824_s4 + $0x8] sm:$0xff]  ;;  %v115_v2 = vld [vmem:[%s1824_s4 + $0x10] sm:$0xff] }
  0x29   : > { %1175 = vmatpush.xpose.msk.msra.mxu2 %vm195_vm0, %v173_v20  ;;  %v179_v61 = vld [vmem:[%s2024_s0 + $0x180] sm:$0xff]  ;;  %v116_v3 = vld [vmem:[%s1824_s4 + $0x18] sm:$0xff]  ;;  %v118_v5 = vld [vmem:[%s1824_s4 + $0x28] sm:$0xff] }
  0x2a   : > { %1207 = vmatpush.xpose.msk.msra.mxu3 %vm195_vm0, %v189_v21  ;;  %v131_v62 = vld [vmem:[%s2024_s0] sm:$0xff]  ;;  %v119_v6 = vld [vmem:[%s1824_s4 + $0x30] sm:$0xff]  ;;  %v120_v7 = vld [vmem:[%s1824_s4 + $0x38] sm:$0xff] }
  0x2b   : > { %1111 = vmatpush.xpose.msk.msra.mxu0 %vm195_vm0, %v141_v22  ;;  %v147_v63 = vld [vmem:[%s2024_s0 + $0x80] sm:$0xff]  ;;  %v122_v9 = vld [vmem:[%s1824_s4 + $0x48] sm:$0xff]  ;;  %v123_v10 = vld [vmem:[%s1824_s4 + $0x50] sm:$0xff] }
  0x2c   : > { %1143 = vmatpush.xpose.msk.msra.mxu1 %vm195_vm0, %v157_v23  ;;  %v113_v0 = vld [vmem:[%s1824_s4] sm:$0xff]  ;;  %v124_v11 = vld [vmem:[%s1824_s4 + $0x58] sm:$0xff]  ;;  %v126_v13 = vld [vmem:[%s1824_s4 + $0x68] sm:$0xff] }
  0x2d   : > { %1176 = vmatpush.xpose.msk.msra.mxu2 %vm195_vm0, %v172_v24  ;;  %v117_v4 = vld [vmem:[%s1824_s4 + $0x20] sm:$0xff]  ;;  %v127_v14 = vld [vmem:[%s1824_s4 + $0x70] sm:$0xff]  ;;  %v128_v15 = vld [vmem:[%s1824_s4 + $0x78] sm:$0xff] }
  0x2e   : > { %1208 = vmatpush.xpose.msk.msra.mxu3 %vm195_vm0, %v188_v25  ;;  %v121_v8 = vld [vmem:[%s1824_s4 + $0x40] sm:$0xff] }
  0x2f   : > { %1112 = vmatpush.xpose.msk.msra.mxu0 %vm195_vm0, %v140_v26  ;;  %v125_v12 = vld [vmem:[%s1824_s4 + $0x60] sm:$0xff] }
  0x30   : > { %1144 = vmatpush.xpose.msk.msra.mxu1 %vm195_vm0, %v156_v27 }
  0x31   : > { %1177 = vmatpush.xpose.msk.msra.mxu2 %vm195_vm0, %v171_v28 }
  0x32   : > { %1209 = vmatpush.xpose.msk.msra.mxu3 %vm195_vm0, %v187_v29 }
  0x33   : > { %1113 = vmatpush.xpose.msk.msra.mxu0 %vm195_vm0, %v139_v30 }
  0x34   : > { %1145 = vmatpush.xpose.msk.msra.mxu1 %vm195_vm0, %v155_v31 }
  0x35   : > { %1178 = vmatpush.xpose.msk.msra.mxu2 %vm195_vm0, %v170_v32 }
  0x36   : > { %1210 = vmatpush.xpose.msk.msra.mxu3 %vm195_vm0, %v186_v33 }
  0x37   : > { %1114 = vmatpush.xpose.msk.msra.mxu0 %vm195_vm0, %v138_v34 }
  0x38   : > { %1146 = vmatpush.xpose.msk.msra.mxu1 %vm195_vm0, %v154_v35 }
  0x39   : > { %1179 = vmatpush.xpose.msk.msra.mxu2 %vm195_vm0, %v169_v36 }
  0x3a   : > { %1211 = vmatpush.xpose.msk.msra.mxu3 %vm195_vm0, %v185_v37 }
  0x3b   : > { %1115 = vmatpush.xpose.msk.msra.mxu0 %vm195_vm0, %v137_v38 }
  0x3c   : > { %1147 = vmatpush.xpose.msk.msra.mxu1 %vm195_vm0, %v153_v39 }
  0x3d   : > { %1180 = vmatpush.xpose.msk.msra.mxu2 %vm195_vm0, %v168_v40 }
  0x3e   : > { %1212 = vmatpush.xpose.msk.msra.mxu3 %vm195_vm0, %v184_v41 }
  0x3f   : > { %1116 = vmatpush.xpose.msk.msra.mxu0 %vm195_vm0, %v136_v42 }
  0x40   : > { %1148 = vmatpush.xpose.msk.msra.mxu1 %vm195_vm0, %v152_v43 }
  0x41   : > { %1181 = vmatpush.xpose.msk.msra.mxu2 %vm195_vm0, %v167_v44 }
  0x42   : > { %1213 = vmatpush.xpose.msk.msra.mxu3 %vm195_vm0, %v183_v45 }
  0x43   : > { %1117 = vmatpush.xpose.msk.msra.mxu0 %vm195_vm0, %v135_v46 }
  0x44   : > { %1149 = vmatpush.xpose.msk.msra.mxu1 %vm195_vm0, %v151_v47 }
  0x45   : > { %1182 = vmatpush.xpose.msk.msra.mxu2 %vm195_vm0, %v166_v48 }
  0x46   : > { %1214 = vmatpush.xpose.msk.msra.mxu3 %vm195_vm0, %v182_v49 }
  0x47   : > { %1118 = vmatpush.xpose.msk.msra.mxu0 %vm195_vm0, %v134_v50 }
  0x48   : > { %1150 = vmatpush.xpose.msk.msra.mxu1 %vm195_vm0, %v150_v51 }
  0x49   : > { %1183 = vmatpush.xpose.msk.msra.mxu2 %vm195_vm0, %v165_v52 }
  0x4a   : > { %1215 = vmatpush.xpose.msk.msra.mxu3 %vm195_vm0, %v181_v53 }
  0x4b   : > { %1119 = vmatpush.xpose.msk.msra.mxu0 %vm195_vm0, %v133_v54 }
  0x4c   : > { %1151 = vmatpush.xpose.msk.msra.mxu1 %vm195_vm0, %v149_v55 }
  0x4d   : > { %1184 = vmatpush.xpose.msk.msra.mxu2 %vm195_vm0, %v164_v56 }
  0x4e   : > { %1216 = vmatpush.xpose.msk.msra.mxu3 %vm195_vm0, %v180_v57 }
  0x4f   : > { %1120 = vmatpush.xpose.msk.msra.mxu0 %vm195_vm0, %v132_v58 }
  0x50   : > { %1152 = vmatpush.xpose.msk.msra.mxu1 %vm195_vm0, %v148_v59 }
  0x51   : > { %1185 = vmatpush.xpose.msk.msra.mxu2 %vm195_vm0, %v163_v60 }
  0x52   : > { %1217 = vmatpush.xpose.msk.msra.mxu3 %vm195_vm0, %v179_v61 }
  0x53   : > { %1121 = vmatpush.xpose.msk.msra.mxu0 %vm195_vm0, %v131_v62 }
  0x54   : > { %1153 = vmatpush.xpose.msk.msra.mxu1 %vm195_vm0, %v147_v63  ;;  %1186 = vmatmul.msk.f32.vlgmr.msra.gmra.mxu2 %vm195_vm0, %v113_v0 }
  0x55   : > { %1218 = vmatmul.msk.f32.vlgmr.msra.gmra.mxu3 %vm195_vm0, %v113_v0 }
  0x56   : > { %1122 = vmatmul.msk.f32.vlgmr.msra.gmra.mxu0 %vm195_vm0, %v113_v0 }
  0x57   : > { %1154 = vmatmul.msk.f32.vlgmr.msra.gmra.mxu1 %vm195_vm0, %v113_v0 }
  0x5c   : > { %1187 = vmatmul.msk.f32.gmra.mxu2 %vm195_vm0, %v114_v1 }
  0x5d   : > { %1219 = vmatmul.msk.f32.gmra.mxu3 %vm195_vm0, %v114_v1 }
  0x5e   : > { %1123 = vmatmul.msk.f32.gmra.mxu0 %vm195_vm0, %v114_v1 }
  0x5f   : > { %1155 = vmatmul.msk.f32.gmra.mxu1 %vm195_vm0, %v114_v1 }
  0x64   : > { %1188 = vmatmul.msk.f32.gmra.mxu2 %vm195_vm0, %v115_v2 }
  0x65   : > { %1220 = vmatmul.msk.f32.gmra.mxu3 %vm195_vm0, %v115_v2 }
  0x66   : > { %1124 = vmatmul.msk.f32.gmra.mxu0 %vm195_vm0, %v115_v2 }
  0x67   : > { %1156 = vmatmul.msk.f32.gmra.mxu1 %vm195_vm0, %v115_v2 }
  0x6c   : > { %1189 = vmatmul.msk.f32.gmra.mxu2 %vm195_vm0, %v116_v3 }
  0x6d   : > { %1221 = vmatmul.msk.f32.gmra.mxu3 %vm195_vm0, %v116_v3 }
  0x6e   : > { %1125 = vmatmul.msk.f32.gmra.mxu0 %vm195_vm0, %v116_v3 }
  0x6f   : > { %1157 = vmatmul.msk.f32.gmra.mxu1 %vm195_vm0, %v116_v3 }
  0x74   : > { %1190 = vmatmul.msk.f32.gmra.mxu2 %vm195_vm0, %v117_v4 }
  0x75   : > { %1222 = vmatmul.msk.f32.gmra.mxu3 %vm195_vm0, %v117_v4 }
  0x76   : > { %1126 = vmatmul.msk.f32.gmra.mxu0 %vm195_vm0, %v117_v4 }
  0x77   : > { %1158 = vmatmul.msk.f32.gmra.mxu1 %vm195_vm0, %v117_v4 }
  0x7c   : > { %1191 = vmatmul.msk.f32.gmra.mxu2 %vm195_vm0, %v118_v5 }
  0x7d   : > { %1223 = vmatmul.msk.f32.gmra.mxu3 %vm195_vm0, %v118_v5 }
  0x7e   : > { %1127 = vmatmul.msk.f32.gmra.mxu0 %vm195_vm0, %v118_v5 }
  0x7f   : > { %1159 = vmatmul.msk.f32.gmra.mxu1 %vm195_vm0, %v118_v5 }
  0x84   : > { %1192 = vmatmul.msk.f32.gmra.mxu2 %vm195_vm0, %v119_v6 }
  0x85   : > { %1224 = vmatmul.msk.f32.gmra.mxu3 %vm195_vm0, %v119_v6 }
  0x86   : > { %1128 = vmatmul.msk.f32.gmra.mxu0 %vm195_vm0, %v119_v6 }
  0x87   : > { %1160 = vmatmul.msk.f32.gmra.mxu1 %vm195_vm0, %v119_v6 }
  0x8c   : > { %1193 = vmatmul.msk.f32.gmra.mxu2 %vm195_vm0, %v120_v7 }
  0x8d   : > { %1225 = vmatmul.msk.f32.gmra.mxu3 %vm195_vm0, %v120_v7 }
  0x8e   : > { %1129 = vmatmul.msk.f32.gmra.mxu0 %vm195_vm0, %v120_v7 }
  0x8f   : > { %1161 = vmatmul.msk.f32.gmra.mxu1 %vm195_vm0, %v120_v7 }
  0x94   : > { %1194 = vmatmul.msk.f32.gmra.mxu2 %vm195_vm0, %v121_v8 }
  0x95   : > { %1226 = vmatmul.msk.f32.gmra.mxu3 %vm195_vm0, %v121_v8 }
  0x96   : > { %1130 = vmatmul.msk.f32.gmra.mxu0 %vm195_vm0, %v121_v8 }
  0x97   : > { %1162 = vmatmul.msk.f32.gmra.mxu1 %vm195_vm0, %v121_v8 }
  0x9c   : > { %1195 = vmatmul.msk.f32.gmra.mxu2 %vm195_vm0, %v122_v9 }
  0x9d   : > { %1227 = vmatmul.msk.f32.gmra.mxu3 %vm195_vm0, %v122_v9 }
  0x9e   : > { %1131 = vmatmul.msk.f32.gmra.mxu0 %vm195_vm0, %v122_v9 }
  0x9f   : > { %1163 = vmatmul.msk.f32.gmra.mxu1 %vm195_vm0, %v122_v9 }
  0xa4   : > { %1196 = vmatmul.msk.f32.gmra.mxu2 %vm195_vm0, %v123_v10 }
  0xa5   : > { %1228 = vmatmul.msk.f32.gmra.mxu3 %vm195_vm0, %v123_v10 }
  0xa6   : > { %1132 = vmatmul.msk.f32.gmra.mxu0 %vm195_vm0, %v123_v10 }
  0xa7   : > { %1164 = vmatmul.msk.f32.gmra.mxu1 %vm195_vm0, %v123_v10 }
  0xac   : > { %1197 = vmatmul.msk.f32.gmra.mxu2 %vm195_vm0, %v124_v11 }
  0xad   : > { %1229 = vmatmul.msk.f32.gmra.mxu3 %vm195_vm0, %v124_v11 }
  0xae   : > { %1133 = vmatmul.msk.f32.gmra.mxu0 %vm195_vm0, %v124_v11 }
  0xaf   : > { %1165 = vmatmul.msk.f32.gmra.mxu1 %vm195_vm0, %v124_v11 }
  0xb4   : > { %1198 = vmatmul.msk.f32.gmra.mxu2 %vm195_vm0, %v125_v12 }
  0xb5   : > { %1230 = vmatmul.msk.f32.gmra.mxu3 %vm195_vm0, %v125_v12 }
  0xb6   : > { %1134 = vmatmul.msk.f32.gmra.mxu0 %vm195_vm0, %v125_v12 }
  0xb7   : > { %1166 = vmatmul.msk.f32.gmra.mxu1 %vm195_vm0, %v125_v12 }
  0xbc   : > { %1199 = vmatmul.msk.f32.gmra.mxu2 %vm195_vm0, %v126_v13 }
  0xbd   : > { %1231 = vmatmul.msk.f32.gmra.mxu3 %vm195_vm0, %v126_v13 }
  0xbe   : > { %1135 = vmatmul.msk.f32.gmra.mxu0 %vm195_vm0, %v126_v13 }
  0xbf   : > { %1167 = vmatmul.msk.f32.gmra.mxu1 %vm195_vm0, %v126_v13 }
  0xc4   : > { %1200 = vmatmul.msk.f32.gmra.mxu2 %vm195_vm0, %v127_v14 }
  0xc5   : > { %1232 = vmatmul.msk.f32.gmra.mxu3 %vm195_vm0, %v127_v14 }
  0xc6   : > { %1136 = vmatmul.msk.f32.gmra.mxu0 %vm195_vm0, %v127_v14 }
  0xc7   : > { %1168 = vmatmul.msk.f32.gmra.mxu1 %vm195_vm0, %v127_v14 }
  0xcc   : > { %1201 = vmatmul.msk.f32.gmra.mxu2 %vm195_vm0, %v128_v15 }
  0xcd   : > { %1233 = vmatmul.msk.f32.gmra.mxu3 %vm195_vm0, %v128_v15 }
  0xce   : > { %1137 = vmatmul.msk.f32.gmra.mxu0 %vm195_vm0, %v128_v15 }
  0xcf   : > { %1169 = vmatmul.msk.f32.gmra.mxu1 %vm195_vm0, %v128_v15 }
  0xd3   : > { %v453_v16 = vpop.f32.mrf.mxu0 }
  0xd4   : > { %v518_v17 = vpop.f32.mrf.mxu1  ;;  %v696_v18 = vmul.f32 0.5, %v453_v16 }
  0xd5   : > { %v697_v19 = vmul.f32 0.5, %v518_v17 }
  0xd6   : > { %1299 = vtanh.f32 %v696_v18 }
  0xd7   : > { %1301 = vtanh.f32 %v697_v19  ;;  %v583_v20 = vpop.f32.mrf.mxu2 }
  0xd8   : > { %v648_v21 = vpop.f32.mrf.mxu3  ;;  %v698_v22 = vmul.f32 0.5, %v583_v20 }
  0xd9   : > { %v699_v23 = vmul.f32 0.5, %v648_v21 }
  0xda   : > { %1303 = vtanh.f32 %v698_v22 }
  0xdb   : > { %v456_v24 = vpop.f32.mrf.mxu0  ;;  %1305 = vtanh.f32 %v699_v23 }
  0xdc   : > { %v521_v25 = vpop.f32.mrf.mxu1  ;;  %v1300_v26 = vpop.eup %1299  ;;  %v700_v27 = vmul.f32 0.5, %v456_v24 }
  0xdd   : > { %v701_v28 = vmul.f32 0.5, %v521_v25  ;;  %v1302_v29 = vpop.eup %1301  ;;  %v824_v30 = vadd.f32 1.0, %v1300_v26 }
  0xde   : > { %v825_v31 = vadd.f32 1.0, %v1302_v29  ;;  %1307 = vtanh.f32 %v700_v27 }
  0xdf   : > { %v888_v32 = vmul.f32 0.5, %v824_v30  ;;  %1309 = vtanh.f32 %v701_v28  ;;  %v586_v34 = vpop.f32.mrf.mxu2 }
  0xe0   : > { %v889_v33 = vmul.f32 0.5, %v825_v31  ;;  %v651_v35 = vpop.f32.mrf.mxu3  ;;  %v1304_v36 = vpop.eup %1303  ;;  %v702_v37 = vmul.f32 0.5, %v586_v34 }
  0xe1   : > { %952 = vst [vmem:[%s1919_s21] sm:$0xff] %v888_v32  ;;  %v703_v38 = vmul.f32 0.5, %v651_v35  ;;  %v1306_v39 = vpop.eup %1305  ;;  %v826_v40 = vadd.f32 1.0, %v1304_v36 }
  0xe2   : > { %953 = vst [vmem:[%s1919_s21 + $0x8] sm:$0xff] %v889_v33  ;;  %v827_v41 = vadd.f32 1.0, %v1306_v39  ;;  %1311 = vtanh.f32 %v702_v37 }
  0xe3   : > { %v459_v42 = vpop.f32.mrf.mxu0  ;;  %v890_v45 = vmul.f32 0.5, %v826_v40  ;;  %1313 = vtanh.f32 %v703_v38 }
  0xe4   : > { %v524_v43 = vpop.f32.mrf.mxu1  ;;  %v1308_v44 = vpop.eup %1307  ;;  %v704_v46 = vmul.f32 0.5, %v459_v42  ;;  %v891_v49 = vmul.f32 0.5, %v827_v41 }
  0xe5   : > { %v705_v47 = vmul.f32 0.5, %v524_v43  ;;  %v1310_v48 = vpop.eup %1309  ;;  %v828_v50 = vadd.f32 1.0, %v1308_v44  ;;  %954 = vst [vmem:[%s1919_s21 + $0x10] sm:$0xff] %v890_v45 }
  0xe6   : > { %v829_v51 = vadd.f32 1.0, %v1310_v48  ;;  %1315 = vtanh.f32 %v704_v46  ;;  %955 = vst [vmem:[%s1919_s21 + $0x18] sm:$0xff] %v891_v49 }
  0xe7   : > { %v892_v52 = vmul.f32 0.5, %v828_v50  ;;  %1317 = vtanh.f32 %v705_v47  ;;  %v589_v54 = vpop.f32.mrf.mxu2 }
  0xe8   : > { %v893_v53 = vmul.f32 0.5, %v829_v51  ;;  %v654_v55 = vpop.f32.mrf.mxu3  ;;  %v1312_v56 = vpop.eup %1311  ;;  %v706_v57 = vmul.f32 0.5, %v589_v54 }
  0xe9   : > { %956 = vst [vmem:[%s1919_s21 + $0x20] sm:$0xff] %v892_v52  ;;  %v707_v58 = vmul.f32 0.5, %v654_v55  ;;  %v1314_v59 = vpop.eup %1313  ;;  %v830_v60 = vadd.f32 1.0, %v1312_v56 }
  0xea   : > { %957 = vst [vmem:[%s1919_s21 + $0x28] sm:$0xff] %v893_v53  ;;  %v831_v61 = vadd.f32 1.0, %v1314_v59  ;;  %1319 = vtanh.f32 %v706_v57 }
  0xeb   : > { %v462_v62 = vpop.f32.mrf.mxu0  ;;  %v894_v1 = vmul.f32 0.5, %v830_v60  ;;  %1321 = vtanh.f32 %v707_v58 }
  0xec   : > { %v527_v63 = vpop.f32.mrf.mxu1  ;;  %v1316_v0 = vpop.eup %1315  ;;  %v708_v2 = vmul.f32 0.5, %v462_v62  ;;  %v895_v5 = vmul.f32 0.5, %v831_v61 }
  0xed   : > { %v709_v3 = vmul.f32 0.5, %v527_v63  ;;  %v1318_v4 = vpop.eup %1317  ;;  %v832_v6 = vadd.f32 1.0, %v1316_v0  ;;  %958 = vst [vmem:[%s1919_s21 + $0x30] sm:$0xff] %v894_v1 }
  0xee   : > { %v833_v7 = vadd.f32 1.0, %v1318_v4  ;;  %1323 = vtanh.f32 %v708_v2  ;;  %959 = vst [vmem:[%s1919_s21 + $0x38] sm:$0xff] %v895_v5 }
  0xef   : > { %v896_v8 = vmul.f32 0.5, %v832_v6  ;;  %1325 = vtanh.f32 %v709_v3  ;;  %v592_v10 = vpop.f32.mrf.mxu2 }
  0xf0   : > { %v897_v9 = vmul.f32 0.5, %v833_v7  ;;  %v657_v11 = vpop.f32.mrf.mxu3  ;;  %v1320_v12 = vpop.eup %1319  ;;  %v710_v13 = vmul.f32 0.5, %v592_v10 }
  0xf1   : > { %960 = vst [vmem:[%s1919_s21 + $0x40] sm:$0xff] %v896_v8  ;;  %v711_v14 = vmul.f32 0.5, %v657_v11  ;;  %v1322_v15 = vpop.eup %1321  ;;  %v834_v16 = vadd.f32 1.0, %v1320_v12 }
  0xf2   : > { %961 = vst [vmem:[%s1919_s21 + $0x48] sm:$0xff] %v897_v9  ;;  %v835_v17 = vadd.f32 1.0, %v1322_v15  ;;  %1327 = vtanh.f32 %v710_v13 }
  0xf3   : > { %v465_v18 = vpop.f32.mrf.mxu0  ;;  %v898_v21 = vmul.f32 0.5, %v834_v16  ;;  %1329 = vtanh.f32 %v711_v14 }
  0xf4   : > { %v530_v19 = vpop.f32.mrf.mxu1  ;;  %v1324_v20 = vpop.eup %1323  ;;  %v712_v22 = vmul.f32 0.5, %v465_v18  ;;  %v899_v25 = vmul.f32 0.5, %v835_v17 }
  0xf5   : > { %v713_v23 = vmul.f32 0.5, %v530_v19  ;;  %v1326_v24 = vpop.eup %1325  ;;  %v836_v26 = vadd.f32 1.0, %v1324_v20  ;;  %962 = vst [vmem:[%s1919_s21 + $0x50] sm:$0xff] %v898_v21 }
  0xf6   : > { %v837_v27 = vadd.f32 1.0, %v1326_v24  ;;  %1331 = vtanh.f32 %v712_v22  ;;  %963 = vst [vmem:[%s1919_s21 + $0x58] sm:$0xff] %v899_v25 }
  0xf7   : > { %v900_v28 = vmul.f32 0.5, %v836_v26  ;;  %1333 = vtanh.f32 %v713_v23  ;;  %v595_v30 = vpop.f32.mrf.mxu2 }
  0xf8   : > { %v901_v29 = vmul.f32 0.5, %v837_v27  ;;  %v660_v31 = vpop.f32.mrf.mxu3  ;;  %v1328_v32 = vpop.eup %1327  ;;  %v714_v33 = vmul.f32 0.5, %v595_v30 }
  0xf9   : > { %964 = vst [vmem:[%s1919_s21 + $0x60] sm:$0xff] %v900_v28  ;;  %v715_v34 = vmul.f32 0.5, %v660_v31  ;;  %v1330_v35 = vpop.eup %1329  ;;  %v838_v36 = vadd.f32 1.0, %v1328_v32 }
  0xfa   : > { %965 = vst [vmem:[%s1919_s21 + $0x68] sm:$0xff] %v901_v29  ;;  %v839_v37 = vadd.f32 1.0, %v1330_v35  ;;  %1335 = vtanh.f32 %v714_v33 }
  0xfb   : > { %v468_v38 = vpop.f32.mrf.mxu0  ;;  %v902_v41 = vmul.f32 0.5, %v838_v36  ;;  %1337 = vtanh.f32 %v715_v34 }
  0xfc   : > { %v533_v39 = vpop.f32.mrf.mxu1  ;;  %v1332_v40 = vpop.eup %1331  ;;  %v716_v42 = vmul.f32 0.5, %v468_v38  ;;  %v903_v45 = vmul.f32 0.5, %v839_v37 }
  0xfd   : > { %v717_v43 = vmul.f32 0.5, %v533_v39  ;;  %v1334_v44 = vpop.eup %1333  ;;  %v840_v46 = vadd.f32 1.0, %v1332_v40  ;;  %966 = vst [vmem:[%s1919_s21 + $0x70] sm:$0xff] %v902_v41 }
  0xfe   : > { %v841_v47 = vadd.f32 1.0, %v1334_v44  ;;  %1339 = vtanh.f32 %v716_v42  ;;  %967 = vst [vmem:[%s1919_s21 + $0x78] sm:$0xff] %v903_v45 }
  0xff   : > { %v904_v48 = vmul.f32 0.5, %v840_v46  ;;  %1341 = vtanh.f32 %v717_v43  ;;  %v598_v50 = vpop.f32.mrf.mxu2 }
 0x100   : > { %v905_v49 = vmul.f32 0.5, %v841_v47  ;;  %v663_v51 = vpop.f32.mrf.mxu3  ;;  %v1336_v52 = vpop.eup %1335  ;;  %v718_v53 = vmul.f32 0.5, %v598_v50 }
 0x101   : > { %968 = vst [vmem:[%s1919_s21 + $0x80] sm:$0xff] %v904_v48  ;;  %v719_v54 = vmul.f32 0.5, %v663_v51  ;;  %v1338_v55 = vpop.eup %1337  ;;  %v842_v56 = vadd.f32 1.0, %v1336_v52 }
 0x102   : > { %969 = vst [vmem:[%s1919_s21 + $0x88] sm:$0xff] %v905_v49  ;;  %v843_v57 = vadd.f32 1.0, %v1338_v55  ;;  %1343 = vtanh.f32 %v718_v53 }
 0x103   : > { %v471_v58 = vpop.f32.mrf.mxu0  ;;  %v906_v61 = vmul.f32 0.5, %v842_v56  ;;  %1345 = vtanh.f32 %v719_v54 }
 0x104   : > { %v536_v59 = vpop.f32.mrf.mxu1  ;;  %v1340_v60 = vpop.eup %1339  ;;  %v720_v62 = vmul.f32 0.5, %v471_v58  ;;  %v907_v1 = vmul.f32 0.5, %v843_v57 }
 0x105   : > { %v721_v63 = vmul.f32 0.5, %v536_v59  ;;  %v1342_v0 = vpop.eup %1341  ;;  %v844_v2 = vadd.f32 1.0, %v1340_v60  ;;  %970 = vst [vmem:[%s1919_s21 + $0x90] sm:$0xff] %v906_v61 }
 0x106   : > { %v845_v3 = vadd.f32 1.0, %v1342_v0  ;;  %1347 = vtanh.f32 %v720_v62  ;;  %971 = vst [vmem:[%s1919_s21 + $0x98] sm:$0xff] %v907_v1 }
 0x107   : > { %v908_v4 = vmul.f32 0.5, %v844_v2  ;;  %1349 = vtanh.f32 %v721_v63  ;;  %v601_v6 = vpop.f32.mrf.mxu2 }
 0x108   : > { %v909_v5 = vmul.f32 0.5, %v845_v3  ;;  %v666_v7 = vpop.f32.mrf.mxu3  ;;  %v1344_v8 = vpop.eup %1343  ;;  %v722_v9 = vmul.f32 0.5, %v601_v6 }
 0x109   : > { %972 = vst [vmem:[%s1919_s21 + $0xa0] sm:$0xff] %v908_v4  ;;  %v723_v10 = vmul.f32 0.5, %v666_v7  ;;  %v1346_v11 = vpop.eup %1345  ;;  %v846_v12 = vadd.f32 1.0, %v1344_v8 }
 0x10a   : > { %973 = vst [vmem:[%s1919_s21 + $0xa8] sm:$0xff] %v909_v5  ;;  %v847_v13 = vadd.f32 1.0, %v1346_v11  ;;  %1351 = vtanh.f32 %v722_v9 }
 0x10b   : > { %v474_v14 = vpop.f32.mrf.mxu0  ;;  %v910_v17 = vmul.f32 0.5, %v846_v12  ;;  %1353 = vtanh.f32 %v723_v10 }
 0x10c   : > { %v539_v15 = vpop.f32.mrf.mxu1  ;;  %v1348_v16 = vpop.eup %1347  ;;  %v724_v18 = vmul.f32 0.5, %v474_v14  ;;  %v911_v21 = vmul.f32 0.5, %v847_v13 }
 0x10d   : > { %v725_v19 = vmul.f32 0.5, %v539_v15  ;;  %v1350_v20 = vpop.eup %1349  ;;  %v848_v22 = vadd.f32 1.0, %v1348_v16  ;;  %974 = vst [vmem:[%s1919_s21 + $0xb0] sm:$0xff] %v910_v17 }
 0x10e   : > { %v849_v23 = vadd.f32 1.0, %v1350_v20  ;;  %1355 = vtanh.f32 %v724_v18  ;;  %975 = vst [vmem:[%s1919_s21 + $0xb8] sm:$0xff] %v911_v21 }
 0x10f   : > { %v912_v24 = vmul.f32 0.5, %v848_v22  ;;  %1357 = vtanh.f32 %v725_v19  ;;  %v604_v26 = vpop.f32.mrf.mxu2 }
 0x110   : > { %v913_v25 = vmul.f32 0.5, %v849_v23  ;;  %v669_v27 = vpop.f32.mrf.mxu3  ;;  %v1352_v28 = vpop.eup %1351  ;;  %v726_v29 = vmul.f32 0.5, %v604_v26 }
 0x111   : > { %976 = vst [vmem:[%s1919_s21 + $0xc0] sm:$0xff] %v912_v24  ;;  %v727_v30 = vmul.f32 0.5, %v669_v27  ;;  %v1354_v31 = vpop.eup %1353  ;;  %v850_v32 = vadd.f32 1.0, %v1352_v28 }
 0x112   : > { %977 = vst [vmem:[%s1919_s21 + $0xc8] sm:$0xff] %v913_v25  ;;  %v851_v33 = vadd.f32 1.0, %v1354_v31  ;;  %1359 = vtanh.f32 %v726_v29 }
 0x113   : > { %v477_v34 = vpop.f32.mrf.mxu0  ;;  %v914_v37 = vmul.f32 0.5, %v850_v32  ;;  %1361 = vtanh.f32 %v727_v30 }
 0x114   : > { %v542_v35 = vpop.f32.mrf.mxu1  ;;  %v1356_v36 = vpop.eup %1355  ;;  %v728_v38 = vmul.f32 0.5, %v477_v34  ;;  %v915_v41 = vmul.f32 0.5, %v851_v33 }
 0x115   : > { %v729_v39 = vmul.f32 0.5, %v542_v35  ;;  %v1358_v40 = vpop.eup %1357  ;;  %v852_v42 = vadd.f32 1.0, %v1356_v36  ;;  %978 = vst [vmem:[%s1919_s21 + $0xd0] sm:$0xff] %v914_v37 }
 0x116   : > { %v853_v43 = vadd.f32 1.0, %v1358_v40  ;;  %1363 = vtanh.f32 %v728_v38  ;;  %979 = vst [vmem:[%s1919_s21 + $0xd8] sm:$0xff] %v915_v41 }
 0x117   : > { %v916_v44 = vmul.f32 0.5, %v852_v42  ;;  %1365 = vtanh.f32 %v729_v39  ;;  %v607_v46 = vpop.f32.mrf.mxu2 }
 0x118   : > { %v917_v45 = vmul.f32 0.5, %v853_v43  ;;  %v672_v47 = vpop.f32.mrf.mxu3  ;;  %v1360_v48 = vpop.eup %1359  ;;  %v730_v49 = vmul.f32 0.5, %v607_v46 }
 0x119   : > { %980 = vst [vmem:[%s1919_s21 + $0xe0] sm:$0xff] %v916_v44  ;;  %v731_v50 = vmul.f32 0.5, %v672_v47  ;;  %v1362_v51 = vpop.eup %1361  ;;  %v854_v52 = vadd.f32 1.0, %v1360_v48 }
 0x11a   : > { %981 = vst [vmem:[%s1919_s21 + $0xe8] sm:$0xff] %v917_v45  ;;  %v855_v53 = vadd.f32 1.0, %v1362_v51  ;;  %1367 = vtanh.f32 %v730_v49 }
 0x11b   : > { %v480_v54 = vpop.f32.mrf.mxu0  ;;  %v918_v57 = vmul.f32 0.5, %v854_v52  ;;  %1369 = vtanh.f32 %v731_v50 }
 0x11c   : > { %v545_v55 = vpop.f32.mrf.mxu1  ;;  %v1364_v56 = vpop.eup %1363  ;;  %v732_v58 = vmul.f32 0.5, %v480_v54  ;;  %v919_v61 = vmul.f32 0.5, %v855_v53 }
 0x11d   : > { %v733_v59 = vmul.f32 0.5, %v545_v55  ;;  %v1366_v60 = vpop.eup %1365  ;;  %v856_v62 = vadd.f32 1.0, %v1364_v56  ;;  %982 = vst [vmem:[%s1919_s21 + $0xf0] sm:$0xff] %v918_v57 }
 0x11e   : > { %v857_v63 = vadd.f32 1.0, %v1366_v60  ;;  %1371 = vtanh.f32 %v732_v58  ;;  %983 = vst [vmem:[%s1919_s21 + $0xf8] sm:$0xff] %v919_v61 }
 0x11f   : > { %v920_v0 = vmul.f32 0.5, %v856_v62  ;;  %1373 = vtanh.f32 %v733_v59  ;;  %v610_v2 = vpop.f32.mrf.mxu2 }
 0x120   : > { %v921_v1 = vmul.f32 0.5, %v857_v63  ;;  %v675_v3 = vpop.f32.mrf.mxu3  ;;  %v1368_v4 = vpop.eup %1367  ;;  %v734_v5 = vmul.f32 0.5, %v610_v2 }
 0x121   : > { %984 = vst [vmem:[%s1919_s21 + $0x100] sm:$0xff] %v920_v0  ;;  %v735_v6 = vmul.f32 0.5, %v675_v3  ;;  %v1370_v7 = vpop.eup %1369  ;;  %v858_v8 = vadd.f32 1.0, %v1368_v4 }
 0x122   : > { %985 = vst [vmem:[%s1919_s21 + $0x108] sm:$0xff] %v921_v1  ;;  %v859_v9 = vadd.f32 1.0, %v1370_v7  ;;  %1375 = vtanh.f32 %v734_v5 }
 0x123   : > { %v483_v10 = vpop.f32.mrf.mxu0  ;;  %v922_v13 = vmul.f32 0.5, %v858_v8  ;;  %1377 = vtanh.f32 %v735_v6 }
 0x124   : > { %v548_v11 = vpop.f32.mrf.mxu1  ;;  %v1372_v12 = vpop.eup %1371  ;;  %v736_v14 = vmul.f32 0.5, %v483_v10  ;;  %v923_v17 = vmul.f32 0.5, %v859_v9 }
 0x125   : > { %v737_v15 = vmul.f32 0.5, %v548_v11  ;;  %v1374_v16 = vpop.eup %1373  ;;  %v860_v18 = vadd.f32 1.0, %v1372_v12  ;;  %986 = vst [vmem:[%s1919_s21 + $0x110] sm:$0xff] %v922_v13 }
 0x126   : > { %v861_v19 = vadd.f32 1.0, %v1374_v16  ;;  %1379 = vtanh.f32 %v736_v14  ;;  %987 = vst [vmem:[%s1919_s21 + $0x118] sm:$0xff] %v923_v17 }
 0x127   : > { %v924_v20 = vmul.f32 0.5, %v860_v18  ;;  %1381 = vtanh.f32 %v737_v15  ;;  %v613_v22 = vpop.f32.mrf.mxu2 }
 0x128   : > { %v925_v21 = vmul.f32 0.5, %v861_v19  ;;  %v678_v23 = vpop.f32.mrf.mxu3  ;;  %v1376_v24 = vpop.eup %1375  ;;  %v738_v25 = vmul.f32 0.5, %v613_v22 }
 0x129   : > { %988 = vst [vmem:[%s1919_s21 + $0x120] sm:$0xff] %v924_v20  ;;  %v739_v26 = vmul.f32 0.5, %v678_v23  ;;  %v1378_v27 = vpop.eup %1377  ;;  %v862_v28 = vadd.f32 1.0, %v1376_v24 }
 0x12a   : > { %989 = vst [vmem:[%s1919_s21 + $0x128] sm:$0xff] %v925_v21  ;;  %v863_v29 = vadd.f32 1.0, %v1378_v27  ;;  %1383 = vtanh.f32 %v738_v25 }
 0x12b   : > { %v486_v30 = vpop.f32.mrf.mxu0  ;;  %v926_v33 = vmul.f32 0.5, %v862_v28  ;;  %1385 = vtanh.f32 %v739_v26 }
 0x12c   : > { %v551_v31 = vpop.f32.mrf.mxu1  ;;  %v1380_v32 = vpop.eup %1379  ;;  %v740_v34 = vmul.f32 0.5, %v486_v30  ;;  %v927_v37 = vmul.f32 0.5, %v863_v29 }
 0x12d   : > { %v741_v35 = vmul.f32 0.5, %v551_v31  ;;  %v1382_v36 = vpop.eup %1381  ;;  %v864_v38 = vadd.f32 1.0, %v1380_v32  ;;  %990 = vst [vmem:[%s1919_s21 + $0x130] sm:$0xff] %v926_v33 }
 0x12e   : > { %v865_v39 = vadd.f32 1.0, %v1382_v36  ;;  %1387 = vtanh.f32 %v740_v34  ;;  %991 = vst [vmem:[%s1919_s21 + $0x138] sm:$0xff] %v927_v37 }
 0x12f   : > { %v928_v40 = vmul.f32 0.5, %v864_v38  ;;  %1389 = vtanh.f32 %v741_v35  ;;  %v616_v42 = vpop.f32.mrf.mxu2 }
 0x130   : > { %v929_v41 = vmul.f32 0.5, %v865_v39  ;;  %v681_v43 = vpop.f32.mrf.mxu3  ;;  %v1384_v44 = vpop.eup %1383  ;;  %v742_v45 = vmul.f32 0.5, %v616_v42 }
 0x131   : > { %992 = vst [vmem:[%s1919_s21 + $0x140] sm:$0xff] %v928_v40  ;;  %v743_v46 = vmul.f32 0.5, %v681_v43  ;;  %v1386_v47 = vpop.eup %1385  ;;  %v866_v48 = vadd.f32 1.0, %v1384_v44 }
 0x132   : > { %993 = vst [vmem:[%s1919_s21 + $0x148] sm:$0xff] %v929_v41  ;;  %v867_v49 = vadd.f32 1.0, %v1386_v47  ;;  %1391 = vtanh.f32 %v742_v45 }
 0x133   : > { %v489_v50 = vpop.f32.mrf.mxu0  ;;  %v930_v53 = vmul.f32 0.5, %v866_v48  ;;  %1393 = vtanh.f32 %v743_v46 }
 0x134   : > { %v554_v51 = vpop.f32.mrf.mxu1  ;;  %v1388_v52 = vpop.eup %1387  ;;  %v744_v54 = vmul.f32 0.5, %v489_v50  ;;  %v931_v57 = vmul.f32 0.5, %v867_v49 }
 0x135   : > { %v745_v55 = vmul.f32 0.5, %v554_v51  ;;  %v1390_v56 = vpop.eup %1389  ;;  %v868_v58 = vadd.f32 1.0, %v1388_v52  ;;  %994 = vst [vmem:[%s1919_s21 + $0x150] sm:$0xff] %v930_v53 }
 0x136   : > { %v869_v59 = vadd.f32 1.0, %v1390_v56  ;;  %1395 = vtanh.f32 %v744_v54  ;;  %995 = vst [vmem:[%s1919_s21 + $0x158] sm:$0xff] %v931_v57 }
 0x137   : > { %v932_v60 = vmul.f32 0.5, %v868_v58  ;;  %1397 = vtanh.f32 %v745_v55  ;;  %v619_v62 = vpop.f32.mrf.mxu2 }
 0x138   : > { %v933_v61 = vmul.f32 0.5, %v869_v59  ;;  %v684_v63 = vpop.f32.mrf.mxu3  ;;  %v1392_v0 = vpop.eup %1391  ;;  %v746_v1 = vmul.f32 0.5, %v619_v62 }
 0x139   : > { %996 = vst [vmem:[%s1919_s21 + $0x160] sm:$0xff] %v932_v60  ;;  %v747_v2 = vmul.f32 0.5, %v684_v63  ;;  %v1394_v3 = vpop.eup %1393  ;;  %v870_v4 = vadd.f32 1.0, %v1392_v0 }
 0x13a   : > { %997 = vst [vmem:[%s1919_s21 + $0x168] sm:$0xff] %v933_v61  ;;  %v871_v5 = vadd.f32 1.0, %v1394_v3  ;;  %1399 = vtanh.f32 %v746_v1 }
 0x13b   : > { %v492_v6 = vpop.f32.mrf.mxu0  ;;  %v934_v9 = vmul.f32 0.5, %v870_v4  ;;  %1401 = vtanh.f32 %v747_v2 }
 0x13c   : > { %v557_v7 = vpop.f32.mrf.mxu1  ;;  %v1396_v8 = vpop.eup %1395  ;;  %v748_v10 = vmul.f32 0.5, %v492_v6  ;;  %v935_v13 = vmul.f32 0.5, %v871_v5 }
 0x13d   : > { %v749_v11 = vmul.f32 0.5, %v557_v7  ;;  %v1398_v12 = vpop.eup %1397  ;;  %v872_v14 = vadd.f32 1.0, %v1396_v8  ;;  %998 = vst [vmem:[%s1919_s21 + $0x170] sm:$0xff] %v934_v9 }
 0x13e   : > { %v873_v15 = vadd.f32 1.0, %v1398_v12  ;;  %1403 = vtanh.f32 %v748_v10  ;;  %999 = vst [vmem:[%s1919_s21 + $0x178] sm:$0xff] %v935_v13 }
 0x13f   : > { %v936_v16 = vmul.f32 0.5, %v872_v14  ;;  %1405 = vtanh.f32 %v749_v11  ;;  %v622_v18 = vpop.f32.mrf.mxu2 }
 0x140   : > { %v937_v17 = vmul.f32 0.5, %v873_v15  ;;  %v687_v19 = vpop.f32.mrf.mxu3  ;;  %v1400_v20 = vpop.eup %1399  ;;  %v750_v21 = vmul.f32 0.5, %v622_v18 }
 0x141   : > { %1000 = vst [vmem:[%s1919_s21 + $0x180] sm:$0xff] %v936_v16  ;;  %v751_v22 = vmul.f32 0.5, %v687_v19  ;;  %v1402_v23 = vpop.eup %1401  ;;  %v874_v24 = vadd.f32 1.0, %v1400_v20 }
 0x142   : > { %1001 = vst [vmem:[%s1919_s21 + $0x188] sm:$0xff] %v937_v17  ;;  %v875_v25 = vadd.f32 1.0, %v1402_v23  ;;  %1407 = vtanh.f32 %v750_v21 }
 0x143   : > { %v495_v26 = vpop.f32.mrf.mxu0  ;;  %v938_v29 = vmul.f32 0.5, %v874_v24  ;;  %1409 = vtanh.f32 %v751_v22 }
 0x144   : > { %v560_v27 = vpop.f32.mrf.mxu1  ;;  %v1404_v28 = vpop.eup %1403  ;;  %v752_v30 = vmul.f32 0.5, %v495_v26  ;;  %v939_v33 = vmul.f32 0.5, %v875_v25 }
 0x145   : > { %v753_v31 = vmul.f32 0.5, %v560_v27  ;;  %v1406_v32 = vpop.eup %1405  ;;  %v876_v34 = vadd.f32 1.0, %v1404_v28  ;;  %1002 = vst [vmem:[%s1919_s21 + $0x190] sm:$0xff] %v938_v29 }
 0x146   : > { %v877_v35 = vadd.f32 1.0, %v1406_v32  ;;  %1411 = vtanh.f32 %v752_v30  ;;  %1003 = vst [vmem:[%s1919_s21 + $0x198] sm:$0xff] %v939_v33 }
 0x147   : > { %v940_v36 = vmul.f32 0.5, %v876_v34  ;;  %1413 = vtanh.f32 %v753_v31  ;;  %v625_v38 = vpop.f32.mrf.mxu2 }
 0x148   : > { %v941_v37 = vmul.f32 0.5, %v877_v35  ;;  %v690_v39 = vpop.f32.mrf.mxu3  ;;  %v1408_v40 = vpop.eup %1407  ;;  %v754_v41 = vmul.f32 0.5, %v625_v38 }
 0x149   : > { %1004 = vst [vmem:[%s1919_s21 + $0x1a0] sm:$0xff] %v940_v36  ;;  %v755_v42 = vmul.f32 0.5, %v690_v39  ;;  %v1410_v43 = vpop.eup %1409  ;;  %v878_v44 = vadd.f32 1.0, %v1408_v40 }
 0x14a   : > { %1005 = vst [vmem:[%s1919_s21 + $0x1a8] sm:$0xff] %v941_v37  ;;  %v879_v45 = vadd.f32 1.0, %v1410_v43  ;;  %1415 = vtanh.f32 %v754_v41 }
 0x14b   : > { %v498_v46 = vpop.f32.mrf.mxu0  ;;  %v942_v49 = vmul.f32 0.5, %v878_v44  ;;  %1417 = vtanh.f32 %v755_v42 }
 0x14c   : > { %v563_v47 = vpop.f32.mrf.mxu1  ;;  %v1412_v48 = vpop.eup %1411  ;;  %v756_v50 = vmul.f32 0.5, %v498_v46  ;;  %v943_v53 = vmul.f32 0.5, %v879_v45 }
 0x14d   : > { %v757_v51 = vmul.f32 0.5, %v563_v47  ;;  %v1414_v52 = vpop.eup %1413  ;;  %v880_v54 = vadd.f32 1.0, %v1412_v48  ;;  %1006 = vst [vmem:[%s1919_s21 + $0x1b0] sm:$0xff] %v942_v49 }
 0x14e   : > { %v881_v55 = vadd.f32 1.0, %v1414_v52  ;;  %1419 = vtanh.f32 %v756_v50  ;;  %1007 = vst [vmem:[%s1919_s21 + $0x1b8] sm:$0xff] %v943_v53 }
 0x14f   : > { %v944_v56 = vmul.f32 0.5, %v880_v54  ;;  %1421 = vtanh.f32 %v757_v51  ;;  %v628_v58 = vpop.f32.mrf.mxu2 }
 0x150   : > { %v945_v57 = vmul.f32 0.5, %v881_v55  ;;  %v693_v59 = vpop.f32.mrf.mxu3  ;;  %v1416_v60 = vpop.eup %1415  ;;  %v758_v61 = vmul.f32 0.5, %v628_v58 }
 0x151   : > { %1008 = vst [vmem:[%s1919_s21 + $0x1c0] sm:$0xff] %v944_v56  ;;  %v759_v62 = vmul.f32 0.5, %v693_v59  ;;  %v1418_v63 = vpop.eup %1417  ;;  %v882_v0 = vadd.f32 1.0, %v1416_v60 }
 0x152   : > { %1009 = vst [vmem:[%s1919_s21 + $0x1c8] sm:$0xff] %v945_v57  ;;  %v883_v1 = vadd.f32 1.0, %v1418_v63  ;;  %1423 = vtanh.f32 %v758_v61 }
 0x153   : > { %v946_v3 = vmul.f32 0.5, %v882_v0  ;;  %1425 = vtanh.f32 %v759_v62 }
 0x154   : > { %v1420_v2 = vpop.eup %1419  ;;  %v947_v5 = vmul.f32 0.5, %v883_v1 }
 0x155   : > { %v1422_v4 = vpop.eup %1421  ;;  %v884_v6 = vadd.f32 1.0, %v1420_v2  ;;  %1010 = vst [vmem:[%s1919_s21 + $0x1d0] sm:$0xff] %v946_v3 }
 0x156   : > { %v885_v7 = vadd.f32 1.0, %v1422_v4  ;;  %1011 = vst [vmem:[%s1919_s21 + $0x1d8] sm:$0xff] %v947_v5 }
 0x157   : > { %v948_v8 = vmul.f32 0.5, %v884_v6 }
 0x158   : > { %v949_v9 = vmul.f32 0.5, %v885_v7  ;;  %v1424_v10 = vpop.eup %1423 }
 0x159   : > { %1012 = vst [vmem:[%s1919_s21 + $0x1e0] sm:$0xff] %v948_v8  ;;  %v1426_v11 = vpop.eup %1425  ;;  %v886_v12 = vadd.f32 1.0, %v1424_v10 }
 0x15a   : > { %1013 = vst [vmem:[%s1919_s21 + $0x1e8] sm:$0xff] %v949_v9  ;;  %v887_v13 = vadd.f32 1.0, %v1426_v11 }
 0x15b   : > { %v950_v14 = vmul.f32 0.5, %v886_v12 }
 0x15c   : > { %v951_v15 = vmul.f32 0.5, %v887_v13 }
 0x15d   : > { %1014 = vst [vmem:[%s1919_s21 + $0x1f0] sm:$0xff] %v950_v14 }
 0x15e   : > { %1015 = vst [vmem:[%s1919_s21 + $0x1f8] sm:$0xff] %v951_v15 }
 0x15f   : > { %1454 = shalt.err (!%p1451_p3)
}
 0x160   : > { %s1507_s12 = smov 512   ;;  %s1508_s13 = smov 32  }
 0x161   : > { %1242 = dma.vmem_to_hbm [thread:$0]  (%p1559_p4), %s1033_s9, 8192, %s1035_s26, %s1017_s27, %s1507_s12, %s1507_s12, %s1508_s13  }
 0x162 PF: > { %p1248_p5 = scmp.ge.s32.totalorder %s1505_s11, 2  ;;  %s1049_s15 = sand.u32 1, %s1485_s6  }
 0x163   : > { %s1050_s17 = scalar_lea.sflag [#allocation3], %s1049_s15 }
 0x164   : > { %p1245_p6 = pnand %p1248_p5, %p1566_p8 }
 0x166   : > { %p1246_p7 = pneg %p1245_p6 }
 0x168   : > { %1480 = dma.done.wait (%p1246_p7), %s1050_s17, 8192  }
 0x169   : > { %1482 = vsyncadd (%p1246_p7), %s1050_s17, 4294959104  ;;  %s14_s11 = sadd.s32 1, %s1505_s11   ;;  %s2028_s6 = smov %s1489_s7 }
 0x16a   : > { %p11_p9 = scmp.ge.s32.totalorder %s14_s11, 4   ;;  %s2029_s7 = smov %s1493_s8 }
 0x16b   : > { %s2030_s8 = smov %s1572_s19  ;;  %s2031_s9 = smov %s1501_s10 }
 0x16c   : > { %s2032_s10 = smov %s2034_s14  ;;  %13 = sbr.rel (!%p11_p9) target bundleno = 4 (0x4), region = 58 }
 0x171   :  { %1056 = vsyncpa [#allocation3], 1 }
 0x172   :  { %1058 = vsyncpa [#allocation3 + $0x1], 1 }

</bundles_post_ra>
